<compile_context>
chip_gen: v7x
topology: tpu7x:2x2x1
jax: 0.10.0
libtpu: 0.0.40
codegen_flags: <defaults>
</compile_context>

<pallas_src>
import functools
import math

import jax
import jax.numpy as jnp
from jax.experimental import pallas as pl
from jax.experimental.pallas import tpu as pltpu

EPS = 1e-5


# --------------------------------------------------------------------------- #
# small helpers
# --------------------------------------------------------------------------- #
def _whole(shape):
    """BlockSpec for a small array kept fully VMEM-resident (same block every step)."""
    nd = len(shape)
    return pl.BlockSpec(shape, lambda *_: (0,) * nd)


def _pick_row_tile(Ho, Wo, target_pix=512):
    """Largest divisor of Ho whose tile holds <= ~target_pix pixel rows."""
    th = 1
    for d in range(1, Ho + 1):
        if Ho % d == 0 and d * Wo <= target_pix:
            th = d
    return th


def _nbytes(*shapes):
    return 4 * sum(math.prod(s) for s in shapes)


def _compiler_params(semantics, block_nbytes):
    # ~2 buffers per gridded operand + slack; floored at the 32 MiB default and kept
    # below v7x's 64 MiB physical VMEM (tiles are sized so this never binds).
    need = 4 * block_nbytes + (1 << 20)
    limit = int(min(max(need, 32 << 20), 60 << 20))
    return pltpu.CompilerParams(dimension_semantics=semantics,
                                vmem_limit_bytes=limit)


def _cost(flops, nbytes):
    return pl.CostEstimate(flops=int(flops), transcendentals=0,
                           bytes_accessed=int(nbytes))


def _bn_affine(stats, count, gamma, beta, eps=EPS):
    """Fold per-batch (sum, sumsq) partials into per-channel BN (scale, bias)."""
    tot = jnp.sum(stats, axis=0)               # (2, C)
    mean = tot[0:1] / count                    # (1, C)
    var = tot[1:2] / count - mean * mean       # biased batch variance (training mode)
    scale = gamma * jax.lax.rsqrt(var + eps)
    bias = beta - mean * scale
    return scale, bias


# --------------------------------------------------------------------------- #
# kernels
# --------------------------------------------------------------------------- #
def _make_conv1_kernel(TH, Wo, Cin, F1, Fsc, mxu_dtype):
    """1x1 conv1 (+ fused 1x1 shortcut conv) on a pixel tile + BN stats accumulation."""
    def kernel(x_ref, w_ref, y1_ref, *rest):
        if Fsc > 0:
            sc_ref, st_ref = rest
        else:
            (st_ref,) = rest

        x2 = x_ref[0].reshape(TH * Wo, Cin)
        y = jnp.dot(x2.astype(mxu_dtype), w_ref[...].astype(mxu_dtype),
                    preferred_element_type=jnp.float32)          # (TH*Wo, F1+Fsc)

        # per-channel sum / sum-of-squares, accumulated over the row-tile axis
        @pl.when(pl.program_id(1) == 0)
        def _():
            st_ref[...] = jnp.zeros_like(st_ref)
        st_ref[0, 0:1, :] += jnp.sum(y, axis=0, keepdims=True)
        st_ref[0, 1:2, :] += jnp.sum(y * y, axis=0, keepdims=True)

        if Fsc > 0:
            y1_ref[0] = y[:, :F1].reshape(TH, Wo, F1)
            sc_ref[0] = y[:, F1:].reshape(TH, Wo, Fsc)
        else:
            y1_ref[0] = y.reshape(TH, Wo, F1)
    return kernel


def _make_conv2_kernel(Ho, Wo, F1, F2, mxu_dtype):
    """BN1 affine + ReLU -> 3x3 conv (stride 1, pad 1) as shifted matmuls + BN2 stats."""
    # TODO(synk): for very large spatial maps, add a row-tile grid axis with halo
    # BlockSpecs instead of one whole image per step.
    def kernel(y1_ref, s1_ref, b1_ref, w2_ref, y2_ref, st_ref):
        s1 = s1_ref[...].reshape(1, 1, F1)
        b1 = b1_ref[...].reshape(1, 1, F1)
        y1 = jnp.maximum(y1_ref[0] * s1 + b1, 0.0)               # (Ho, Wo, F1), f32

        # 3 column-shifted operands (zero halo == padding 1), shared by all 3 rows.
        zc = jnp.zeros((Ho, 1, F1), jnp.float32)
        us = [jnp.concatenate([zc, y1[:, :Wo - 1, :]], axis=1),  # y1[h, w-1]
              y1,                                                # y1[h, w  ]
              jnp.concatenate([y1[:, 1:, :], zc], axis=1)]       # y1[h, w+1]

        zs = []
        for dy in range(3):
            acc = jnp.zeros((Ho * Wo, F2), jnp.float32)
            for dx in range(3):
                acc = acc + jnp.dot(
                    us[dx].reshape(Ho * Wo, F1).astype(mxu_dtype),
                    w2_ref[dy, dx].astype(mxu_dtype),
                    preferred_element_type=jnp.float32)
            zs.append(acc.reshape(Ho, Wo, F2))

        # row shifts (zero halo) and combine
        zr = jnp.zeros((1, Wo, F2), jnp.float32)
        y2 = (jnp.concatenate([zr, zs[0][:Ho - 1]], axis=0)      # z0[h-1]
              + zs[1]
              + jnp.concatenate([zs[2][1:], zr], axis=0))        # z2[h+1]

        y2f = y2.reshape(Ho * Wo, F2)
        st_ref[0, 0:1, :] = jnp.sum(y2f, axis=0, keepdims=True)
        st_ref[0, 1:2, :] = jnp.sum(y2f * y2f, axis=0, keepdims=True)
        y2_ref[0] = y2
    return kernel


def _make_conv3_kernel(TH, Wo, F2, F3, mxu_dtype):
    """BN2 affine + ReLU -> 1x1 conv3 on a pixel tile + BN3 stats accumulation."""
    def kernel(y2_ref, s2_ref, b2_ref, w3_ref, y3_ref, st_ref):
        s2 = s2_ref[...].reshape(1, 1, F2)
        b2 = b2_ref[...].reshape(1, 1, F2)
        y2 = jnp.maximum(y2_ref[0] * s2 + b2, 0.0).reshape(TH * Wo, F2)
        y3 = jnp.dot(y2.astype(mxu_dtype), w3_ref[...].astype(mxu_dtype),
                     preferred_element_type=jnp.float32)         # (TH*Wo, F3)

        @pl.when(pl.program_id(1) == 0)
        def _():
            st_ref[...] = jnp.zeros_like(st_ref)
        st_ref[0, 0:1, :] += jnp.sum(y3, axis=0, keepdims=True)
        st_ref[0, 1:2, :] += jnp.sum(y3 * y3, axis=0, keepdims=True)

        y3_ref[0] = y3.reshape(TH, Wo, F3)
    return kernel


def _make_combine_kernel(F3, has_sc_bn):
    """BN3 (+ BN_shortcut) affine + residual add + final ReLU."""
    def kernel(*refs):
        if has_sc_bn:
            y3_ref, sc_ref, s3_ref, b3_ref, ss_ref, bs_ref, o_ref = refs
        else:
            y3_ref, sc_ref, s3_ref, b3_ref, o_ref = refs
        y3 = y3_ref[0] * s3_ref[...].reshape(1, 1, F3) + b3_ref[...].reshape(1, 1, F3)
        sc = sc_ref[0]
        if has_sc_bn:
            sc = sc * ss_ref[...].reshape(1, 1, F3) + bs_ref[...].reshape(1, 1, F3)
        o_ref[0] = jnp.maximum(y3 + sc, 0.0)
    return kernel


# --------------------------------------------------------------------------- #
# forward pass (NHWC native)
# --------------------------------------------------------------------------- #
def block_forward_nhwc(x_nhwc, params, stride, is_1x1conv, mxu_dtype=jnp.float32):
    N, H, W, Cin = x_nhwc.shape
    assert H % stride == 0 and W % stride == 0, "spatial dims must be divisible by stride"
    Ho, Wo = H // stride, W // stride
    F1 = params["w1"].shape[1]
    F2 = params["w2"].shape[3]
    F3 = params["w3"].shape[1]
    if not is_1x1conv:
        # PyTorch identity residual only type-checks under these conditions.
        assert stride == 1 and Cin == F3, \
            "identity shortcut requires stride == 1 and in_channels == filter3"

    Npix = N * Ho * Wo
    TH = _pick_row_tile(Ho, Wo)
    T = Ho // TH
    f32 = jnp.float32

    # TODO(synk): fold this strided gather (and the NCHW<->NHWC boundary transposes of
    # the wrapper below) into the pass-1 DMA via a strided index_map / pl.ds read; kept
    # as XLA glue here for robustness. An NHWC, stride-1 block pays no glue at all.
    xs = x_nhwc[:, ::stride, ::stride, :] if stride > 1 else x_nhwc

    act_spec = lambda C: pl.BlockSpec((1, TH, Wo, C), lambda n, t: (n, t, 0, 0))
    stat_spec = lambda C: pl.BlockSpec((1, 2, C), lambda n, t: (n, 0, 0))
    img_spec = lambda C: pl.BlockSpec((1, Ho, Wo, C), lambda n: (n, 0, 0, 0))

    # ---- pass 1: conv1 1x1 (+ fused shortcut 1x1) + BN1/BN_sc stats --------------
    Fsc = F3 if is_1x1conv else 0
    Fc = F1 + Fsc
    if is_1x1conv:
        wcat = jnp.concatenate([params["w1"], params["ws"]], axis=1)   # (Cin, F1+F3)
        gcat = jnp.concatenate([params["g1"], params["gs"]], axis=1)
        bcat = jnp.concatenate([params["b1"], params["bs"]], axis=1)
    else:
        wcat, gcat, bcat = params["w1"], params["g1"], params["b1"]

    out_shape1 = [jax.ShapeDtypeStruct((N, Ho, Wo, F1), f32)]
    out_specs1 = [act_spec(F1)]
    if is_1x1conv:
        out_shape1.append(jax.ShapeDtypeStruct((N, Ho, Wo, F3), f32))
        out_specs1.append(act_spec(F3))
    out_shape1.append(jax.ShapeDtypeStruct((N, 2, Fc), f32))
    out_specs1.append(stat_spec(Fc))

    blk1 = _nbytes((TH, Wo, Cin), (TH, Wo, F1), (TH, Wo, Fsc), (Cin, Fc), (2, Fc))
    res1 = pl.pallas_call(
        _make_conv1_kernel(TH, Wo, Cin, F1, Fsc, mxu_dtype),
        grid=(N, T),
        in_specs=[act_spec(Cin), _whole((Cin, Fc))],
        out_specs=tuple(out_specs1),
        out_shape=tuple(out_shape1),
        compiler_params=_compiler_params(("parallel", "arbitrary"), blk1),
        cost_estimate=_cost(2 * Npix * Cin * Fc,
                            _nbytes((N, Ho, Wo, Cin), (Cin, Fc),
                                    (N, Ho, Wo, F1), (N, Ho, Wo, Fsc))),
    )(xs, wcat)

    if is_1x1conv:
        y1_raw, sc_raw, st1 = res1
    else:
        y1_raw, st1 = res1
        sc_raw = None

    scale_c, bias_c = _bn_affine(st1, Npix, gcat, bcat)
    s1v, b1v = scale_c[:, :F1], bias_c[:, :F1]
    if is_1x1conv:
        ssv, bsv = scale_c[:, F1:], bias_c[:, F1:]

    # ---- pass 2: BN1 + ReLU -> 3x3 conv (pad 1) + BN2 stats -----------------------
    blk2 = _nbytes((Ho, Wo, F1), (Ho, Wo, F2), (3, 3, F1, F2), (2, F2))
    y2_raw, st2 = pl.pallas_call(
        _make_conv2_kernel(Ho, Wo, F1, F2, mxu_dtype),
        grid=(N,),
        in_specs=[img_spec(F1), _whole((1, F1)), _whole((1, F1)),
                  _whole((3, 3, F1, F2))],
        out_specs=(img_spec(F2), pl.BlockSpec((1, 2, F2), lambda n: (n, 0, 0))),
        out_shape=(jax.ShapeDtypeStruct((N, Ho, Wo, F2), f32),
                   jax.ShapeDtypeStruct((N, 2, F2), f32)),
        compiler_params=_compiler_params(("parallel",), blk2),
        cost_estimate=_cost(2 * Npix * 9 * F1 * F2,
                            _nbytes((N, Ho, Wo, F1), (N, Ho, Wo, F2), (3, 3, F1, F2))),
    )(y1_raw, s1v, b1v, params["w2"])
    s2v, b2v = _bn_affine(st2, Npix, params["g2"], params["b2"])

    # ---- pass 3: BN2 + ReLU -> 1x1 conv3 + BN3 stats ------------------------------
    blk3 = _nbytes((TH, Wo, F2), (TH, Wo, F3), (F2, F3), (2, F3))
    y3_raw, st3 = pl.pallas_call(
        _make_conv3_kernel(TH, Wo, F2, F3, mxu_dtype),
        grid=(N, T),
        in_specs=[act_spec(F2), _whole((1, F2)), _whole((1, F2)), _whole((F2, F3))],
        out_specs=(act_spec(F3), stat_spec(F3)),
        out_shape=(jax.ShapeDtypeStruct((N, Ho, Wo, F3), f32),
                   jax.ShapeDtypeStruct((N, 2, F3), f32)),
        compiler_params=_compiler_params(("parallel", "arbitrary"), blk3),
        cost_estimate=_cost(2 * Npix * F2 * F3,
                            _nbytes((N, Ho, Wo, F2), (N, Ho, Wo, F3), (F2, F3))),
    )(y2_raw, s2v, b2v, params["w3"])
    s3v, b3v = _bn_affine(st3, Npix, params["g3"], params["b3"])

    # ---- pass 4: BN3 / BN_sc affine + residual add + ReLU -------------------------
    if is_1x1conv:
        ins = [y3_raw, sc_raw, s3v, b3v, ssv, bsv]
        in_specs4 = [act_spec(F3), act_spec(F3), _whole((1, F3)), _whole((1, F3)),
                     _whole((1, F3)), _whole((1, F3))]
    else:
        ins = [y3_raw, xs, s3v, b3v]
        in_specs4 = [act_spec(F3), act_spec(F3), _whole((1, F3)), _whole((1, F3))]

    blk4 = 3 * _nbytes((TH, Wo, F3))
    out = pl.pallas_call(
        _make_combine_kernel(F3, is_1x1conv),
        grid=(N, T),
        in_specs=in_specs4,
        out_specs=act_spec(F3),
        out_shape=jax.ShapeDtypeStruct((N, Ho, Wo, F3), f32),
        compiler_params=_compiler_params(("parallel", "parallel"), blk4),
        cost_estimate=_cost(4 * Npix * F3, 3 * _nbytes((N, Ho, Wo, F3))),
    )(*ins)
    return out


def block_forward_pallas(x_nchw, params, stride, is_1x1conv, mxu_dtype=jnp.float32):
    """PyTorch-layout wrapper: NCHW in / NCHW out (a fully-NHWC model would call
    block_forward_nhwc directly and pay no transpose glue)."""
    x_nhwc = jnp.transpose(x_nchw, (0, 2, 3, 1))
    out_nhwc = block_forward_nhwc(x_nhwc, params, stride, is_1x1conv, mxu_dtype)
    return jnp.transpose(out_nhwc, (0, 3, 1, 2))


# --------------------------------------------------------------------------- #
# pure-JAX reference (PyTorch training-mode BN semantics)
# --------------------------------------------------------------------------- #
def block_forward_ref(x_nchw, params, stride, is_1x1conv):
    def conv(x, w_oihw, s, pad):
        return jax.lax.conv_general_dilated(
            x, w_oihw, (s, s), [(pad, pad), (pad, pad)],
            dimension_numbers=("NCHW", "OIHW", "NCHW"))

    def bn(x, g, b):
        mean = jnp.mean(x, axis=(0, 2, 3), keepdims=True)
        var = jnp.mean(jnp.square(x - mean), axis=(0, 2, 3), keepdims=True)
        return ((x - mean) * jax.lax.rsqrt(var + EPS) *
                g.reshape(1, -1, 1, 1) + b.reshape(1, -1, 1, 1))

    w1 = jnp.transpose(params["w1"])[..., None, None]
    w2 = jnp.transpose(params["w2"], (3, 2, 0, 1))
    w3 = jnp.transpose(params["w3"])[..., None, None]

    y = jax.nn.relu(bn(conv(x_nchw, w1, stride, 0), params["g1"], params["b1"]))
    y = jax.nn.relu(bn(conv(y, w2, 1, 1), params["g2"], params["b2"]))
    y = bn(conv(y, w3, 1, 0), params["g3"], params["b3"])
    if is_1x1conv:
        ws = jnp.transpose(params["ws"])[..., None, None]
        sc = bn(conv(x_nchw, ws, stride, 0), params["gs"], params["bs"])
    else:
        sc = x_nchw
    return jax.nn.relu(y + sc)


def init_params(key, in_channels, filters, is_1x1conv):
    f1, f2, f3 = filters
    ks = jax.random.split(key, 12)

    def w(k, shape):
        return 0.1 * jax.random.normal(k, shape, jnp.float32)

    def gamma(k, c):
        return 1.0 + 0.1 * jax.random.normal(k, (1, c), jnp.float32)

    def beta(k, c):
        return 0.05 * jax.random.normal(k, (1, c), jnp.float32)

    params = {
        "w1": w(ks[0], (in_channels, f1)),
        "g1": gamma(ks[1], f1), "b1": beta(ks[2], f1),
        "w2": w(ks[3], (3, 3, f1, f2)),
        "g2": gamma(ks[4], f2), "b2": beta(ks[5], f2),
        "w3": w(ks[6], (f2, f3)),
        "g3": gamma(ks[7], f3), "b3": beta(ks[8], f3),
    }
    if is_1x1conv:
        params["ws"] = w(ks[9], (in_channels, f3))
        params["gs"] = gamma(ks[10], f3)
        params["bs"] = beta(ks[11], f3)
    return params


if __name__ == "__main__":
    key = jax.random.PRNGKey(0)
    k_x, k_p, k_x2, k_p2 = jax.random.split(key, 4)

    # Config A: projection (1x1) shortcut, stride 2.
    N, Cin, H, W = 2, 4, 16, 16
    filters = (8, 8, 16)
    stride, is_1x1conv = 2, True
    x = jax.random.normal(k_x, (N, Cin, H, W), jnp.float32)
    params = init_params(k_p, Cin, filters, is_1x1conv)
    ref = block_forward_ref(x, params, stride, is_1x1conv)

    fwd_f32 = jax.jit(functools.partial(block_forward_pallas, stride=stride,
                                        is_1x1conv=is_1x1conv, mxu_dtype=jnp.float32))
    out = jax.block_until_ready(fwd_f32(x, params))
    assert out.shape == ref.shape == (N, filters[2], H // stride, W // stride)
    assert jnp.allclose(out, ref, rtol=2e-4, atol=2e-4), \
        f"f32 max abs err = {jnp.max(jnp.abs(out - ref))}"

    # Same block with bf16 MXU operands (fast path on v5e/v6e/v7x; BN/ReLU stay f32).
    fwd_bf16 = jax.jit(functools.partial(block_forward_pallas, stride=stride,
                                         is_1x1conv=is_1x1conv, mxu_dtype=jnp.bfloat16))
    out_bf16 = jax.block_until_ready(fwd_bf16(x, params))
    assert jnp.allclose(out_bf16, ref, rtol=1e-1, atol=1e-1), \
        f"bf16 max abs err = {jnp.max(jnp.abs(out_bf16 - ref))}"

    # Config B: identity shortcut (stride 1, in_channels == filter3).
    N2, Cin2 = 2, 16
    filters2 = (8, 8, 16)
    x2 = jax.random.normal(k_x2, (N2, Cin2, H, W), jnp.float32)
    params2 = init_params(k_p2, Cin2, filters2, False)
    ref2 = block_forward_ref(x2, params2, 1, False)
    fwd_id = jax.jit(functools.partial(block_forward_pallas, stride=1,
                                       is_1x1conv=False, mxu_dtype=jnp.float32))
    out2 = jax.block_until_ready(fwd_id(x2, params2))
    assert jnp.allclose(out2, ref2, rtol=2e-4, atol=2e-4), \
        f"identity max abs err = {jnp.max(jnp.abs(out2 - ref2))}"

    print("KERNEL_OK")
</pallas_src>

<mosaic_0001>
module attributes {stable_mosaic.version = 11 : i64} {
  func.func @kernel(%arg0: i32, %arg1: i32, %arg2: memref<1x8x8x4xf32, #tpu.memory_space<vmem>>, %arg3: memref<4x24xf32, #tpu.memory_space<vmem>>, %arg4: memref<1x8x8x8xf32, #tpu.memory_space<vmem>>, %arg5: memref<1x8x8x16xf32, #tpu.memory_space<vmem>>, %arg6: memref<1x2x24xf32, #tpu.memory_space<vmem>>) attributes {dimension_semantics = [#tpu.dimension_semantics<parallel>, #tpu.dimension_semantics<arbitrary>], iteration_bounds = array<i64: 2, 1>, scalar_prefetch = 0 : i64, scratch_operands = 0 : i64, tpu.core_type = #tpu.core_type<tc>, window_params = [{transform_indices = @transform_0, window_bounds = array<i64: 1, 8, 8, 4>}, {pipeline_mode = #tpu.pipeline_mode<synchronous>, transform_indices = @transform_1, window_bounds = array<i64: 4, 24>}, {transform_indices = @transform_2, window_bounds = array<i64: 1, 8, 8, 8>}, {transform_indices = @transform_3, window_bounds = array<i64: 1, 8, 8, 16>}, {transform_indices = @transform_4, window_bounds = array<i64: 1, 2, 24>}]} {
    %c0 = arith.constant 0 : index
    %c0_0 = arith.constant 0 : index
    %c0_1 = arith.constant 0 : index
    %c0_2 = arith.constant 0 : index
    %0 = vector.load %arg2[%c0, %c0_0, %c0_1, %c0_2] : memref<1x8x8x4xf32, #tpu.memory_space<vmem>>, vector<1x8x8x4xf32>
    %1 = vector.shape_cast %0 : vector<1x8x8x4xf32> to vector<8x8x4xf32>
    %2 = vector.shape_cast %1 : vector<8x8x4xf32> to vector<64x4xf32>
    %c0_3 = arith.constant 0 : index
    %c0_4 = arith.constant 0 : index
    %3 = vector.load %arg3[%c0_3, %c0_4] : memref<4x24xf32, #tpu.memory_space<vmem>>, vector<4x24xf32>
    %cst = arith.constant dense<0.000000e+00> : vector<64x24xf32>
    %4 = tpu.matmul %2, %3, %cst {dimension_numbers = #tpu.dot_dimension_numbers<[1], [0], [0], [1], [0, 0, 1, 1], [], []>} : vector<64x4xf32>, vector<4x24xf32>, vector<64x24xf32> -> vector<64x24xf32>
    %c0_i32 = arith.constant 0 : i32
    %5 = arith.cmpi eq, %arg1, %c0_i32 : i32
    %6 = arith.extui %5 : i1 to i32
    %c0_i32_5 = arith.constant 0 : i32
    %7 = arith.cmpi ne, %6, %c0_i32_5 : i32
    scf.if %7 {
      %cst_27 = arith.constant 0.000000e+00 : f32
      %35 = vector.broadcast %cst_27 : f32 to vector<1x2x24xf32>
      %c0_28 = arith.constant 0 : index
      %c0_29 = arith.constant 0 : index
      %c0_30 = arith.constant 0 : index
      %36 = vector.load %arg6[%c0_28, %c0_29, %c0_30] : memref<1x2x24xf32, #tpu.memory_space<vmem>>, vector<1x2x24xf32>
      tpu.vector_store %arg6[%c0_28, %c0_29, %c0_30], %35 {strides = array<i32>} : memref<1x2x24xf32, #tpu.memory_space<vmem>>, vector<1x2x24xf32>,
    } else {
    }
    %c0_6 = arith.constant 0 : index
    %c0_7 = arith.constant 0 : index
    %c0_8 = arith.constant 0 : index
    %8 = vector.load %arg6[%c0_6, %c0_7, %c0_8] : memref<1x2x24xf32, #tpu.memory_space<vmem>>, vector<1x1x24xf32>
    %9 = vector.shape_cast %8 : vector<1x1x24xf32> to vector<1x24xf32>
    %cst_9 = arith.constant dense<0.000000e+00> : vector<24xf32>
    %10 = vector.multi_reduction <add>, %4, %cst_9 [0] : vector<64x24xf32> to vector<24xf32>
    %11 = vector.shape_cast %10 : vector<24xf32> to vector<1x24xf32>
    %12 = arith.addf %9, %11 : vector<1x24xf32>
    %c0_10 = arith.constant 0 : index
    %c0_11 = arith.constant 0 : index
    %c0_12 = arith.constant 0 : index
    %13 = vector.load %arg6[%c0_10, %c0_11, %c0_12] : memref<1x2x24xf32, #tpu.memory_space<vmem>>, vector<1x1x24xf32>
    %14 = vector.shape_cast %13 : vector<1x1x24xf32> to vector<1x24xf32>
    %15 = vector.shape_cast %12 : vector<1x24xf32> to vector<1x1x24xf32>
    tpu.vector_store %arg6[%c0_10, %c0_11, %c0_12], %15 {strides = array<i32>} : memref<1x2x24xf32, #tpu.memory_space<vmem>>, vector<1x1x24xf32>,
    %c0_13 = arith.constant 0 : index
    %c1 = arith.constant 1 : index
    %c0_14 = arith.constant 0 : index
    %16 = vector.load %arg6[%c0_13, %c1, %c0_14] : memref<1x2x24xf32, #tpu.memory_space<vmem>>, vector<1x1x24xf32>
    %17 = vector.shape_cast %16 : vector<1x1x24xf32> to vector<1x24xf32>
    %18 = arith.mulf %4, %4 : vector<64x24xf32>
    %cst_15 = arith.constant dense<0.000000e+00> : vector<24xf32>
    %19 = vector.multi_reduction <add>, %18, %cst_15 [0] : vector<64x24xf32> to vector<24xf32>
    %20 = vector.shape_cast %19 : vector<24xf32> to vector<1x24xf32>
    %21 = arith.addf %17, %20 : vector<1x24xf32>
    %c0_16 = arith.constant 0 : index
    %c1_17 = arith.constant 1 : index
    %c0_18 = arith.constant 0 : index
    %22 = vector.load %arg6[%c0_16, %c1_17, %c0_18] : memref<1x2x24xf32, #tpu.memory_space<vmem>>, vector<1x1x24xf32>
    %23 = vector.shape_cast %22 : vector<1x1x24xf32> to vector<1x24xf32>
    %24 = vector.shape_cast %21 : vector<1x24xf32> to vector<1x1x24xf32>
    tpu.vector_store %arg6[%c0_16, %c1_17, %c0_18], %24 {strides = array<i32>} : memref<1x2x24xf32, #tpu.memory_space<vmem>>, vector<1x1x24xf32>,
    %25 = vector.extract_strided_slice %4 {offsets = [0, 0], sizes = [64, 8], strides = [1, 1]} : vector<64x24xf32> to vector<64x8xf32>
    %26 = vector.shape_cast %25 : vector<64x8xf32> to vector<8x8x8xf32>
    %c0_19 = arith.constant 0 : index
    %c0_20 = arith.constant 0 : index
    %c0_21 = arith.constant 0 : index
    %c0_22 = arith.constant 0 : index
    %27 = vector.load %arg4[%c0_19, %c0_20, %c0_21, %c0_22] : memref<1x8x8x8xf32, #tpu.memory_space<vmem>>, vector<1x8x8x8xf32>
    %28 = vector.shape_cast %27 : vector<1x8x8x8xf32> to vector<8x8x8xf32>
    %29 = vector.shape_cast %26 : vector<8x8x8xf32> to vector<1x8x8x8xf32>
    tpu.vector_store %arg4[%c0_19, %c0_20, %c0_21, %c0_22], %29 {strides = array<i32>} : memref<1x8x8x8xf32, #tpu.memory_space<vmem>>, vector<1x8x8x8xf32>,
    %30 = vector.extract_strided_slice %4 {offsets = [0, 8], sizes = [64, 16], strides = [1, 1]} : vector<64x24xf32> to vector<64x16xf32>
    %31 = vector.shape_cast %30 : vector<64x16xf32> to vector<8x8x16xf32>
    %c0_23 = arith.constant 0 : index
    %c0_24 = arith.constant 0 : index
    %c0_25 = arith.constant 0 : index
    %c0_26 = arith.constant 0 : index
    %32 = vector.load %arg5[%c0_23, %c0_24, %c0_25, %c0_26] : memref<1x8x8x16xf32, #tpu.memory_space<vmem>>, vector<1x8x8x16xf32>
    %33 = vector.shape_cast %32 : vector<1x8x8x16xf32> to vector<8x8x16xf32>
    %34 = vector.shape_cast %31 : vector<8x8x16xf32> to vector<1x8x8x16xf32>
    tpu.vector_store %arg5[%c0_23, %c0_24, %c0_25, %c0_26], %34 {strides = array<i32>} : memref<1x8x8x16xf32, #tpu.memory_space<vmem>>, vector<1x8x8x16xf32>,
    return
  }
  func.func @transform_0(%arg0: i32, %arg1: i32) -> (i32, i32, i32, i32) {
    %c0_i32 = arith.constant 0 : i32
    %c0_i32_0 = arith.constant 0 : i32
    %c0_i32_1 = arith.constant 0 : i32
    return %arg0, %arg1, %c0_i32, %c0_i32_0 : i32, i32, i32, i32
  }
  func.func @transform_1(%arg0: i32, %arg1: i32) -> (i32, i32) {
    %c0_i32 = arith.constant 0 : i32
    %c0_i32_0 = arith.constant 0 : i32
    %c0_i32_1 = arith.constant 0 : i32
    return %c0_i32, %c0_i32_0 : i32, i32
  }
  func.func @transform_2(%arg0: i32, %arg1: i32) -> (i32, i32, i32, i32) {
    %c0_i32 = arith.constant 0 : i32
    %c0_i32_0 = arith.constant 0 : i32
    %c0_i32_1 = arith.constant 0 : i32
    return %arg0, %arg1, %c0_i32, %c0_i32_0 : i32, i32, i32, i32
  }
  func.func @transform_3(%arg0: i32, %arg1: i32) -> (i32, i32, i32, i32) {
    %c0_i32 = arith.constant 0 : i32
    %c0_i32_0 = arith.constant 0 : i32
    %c0_i32_1 = arith.constant 0 : i32
    return %arg0, %arg1, %c0_i32, %c0_i32_0 : i32, i32, i32, i32
  }
  func.func @transform_4(%arg0: i32, %arg1: i32) -> (i32, i32, i32) {
    %c0_i32 = arith.constant 0 : i32
    %c0_i32_0 = arith.constant 0 : i32
    %c0_i32_1 = arith.constant 0 : i32
    return %arg0, %c0_i32, %c0_i32_0 : i32, i32, i32
  }
}

module attributes {stable_mosaic.version = 11 : i64} {
  func.func @kernel(%arg0: i32, %arg1: memref<1x8x8x8xf32, #tpu.memory_space<vmem>>, %arg2: memref<1x8xf32, #tpu.memory_space<vmem>>, %arg3: memref<1x8xf32, #tpu.memory_space<vmem>>, %arg4: memref<3x3x8x8xf32, #tpu.memory_space<vmem>>, %arg5: memref<1x8x8x8xf32, #tpu.memory_space<vmem>>, %arg6: memref<1x2x8xf32, #tpu.memory_space<vmem>>) attributes {dimension_semantics = [#tpu.dimension_semantics<parallel>], iteration_bounds = array<i64: 2>, scalar_prefetch = 0 : i64, scratch_operands = 0 : i64, tpu.core_type = #tpu.core_type<tc>, window_params = [{transform_indices = @transform_0, window_bounds = array<i64: 1, 8, 8, 8>}, {pipeline_mode = #tpu.pipeline_mode<synchronous>, transform_indices = @transform_1, window_bounds = array<i64: 1, 8>}, {pipeline_mode = #tpu.pipeline_mode<synchronous>, transform_indices = @transform_2, window_bounds = array<i64: 1, 8>}, {pipeline_mode = #tpu.pipeline_mode<synchronous>, transform_indices = @transform_3, window_bounds = array<i64: 3, 3, 8, 8>}, {transform_indices = @transform_4, window_bounds = array<i64: 1, 8, 8, 8>}, {transform_indices = @transform_5, window_bounds = array<i64: 1, 2, 8>}]} {
    %c0 = arith.constant 0 : index
    %c0_0 = arith.constant 0 : index
    %0 = vector.load %arg2[%c0, %c0_0] : memref<1x8xf32, #tpu.memory_space<vmem>>, vector<1x8xf32>
    %1 = vector.shape_cast %0 : vector<1x8xf32> to vector<1x1x8xf32>
    %c0_1 = arith.constant 0 : index
    %c0_2 = arith.constant 0 : index
    %2 = vector.load %arg3[%c0_1, %c0_2] : memref<1x8xf32, #tpu.memory_space<vmem>>, vector<1x8xf32>
    %3 = vector.shape_cast %2 : vector<1x8xf32> to vector<1x1x8xf32>
    %c0_3 = arith.constant 0 : index
    %c0_4 = arith.constant 0 : index
    %c0_5 = arith.constant 0 : index
    %c0_6 = arith.constant 0 : index
    %4 = vector.load %arg1[%c0_3, %c0_4, %c0_5, %c0_6] : memref<1x8x8x8xf32, #tpu.memory_space<vmem>>, vector<1x8x8x8xf32>
    %5 = vector.shape_cast %4 : vector<1x8x8x8xf32> to vector<8x8x8xf32>
    %6 = vector.broadcast %1 : vector<1x1x8xf32> to vector<8x8x8xf32>
    %7 = arith.mulf %5, %6 : vector<8x8x8xf32>
    %8 = vector.broadcast %3 : vector<1x1x8xf32> to vector<8x8x8xf32>
    %9 = arith.addf %7, %8 : vector<8x8x8xf32>
    %cst = arith.constant 0.000000e+00 : f32
    %10 = vector.broadcast %cst : f32 to vector<8x8x8xf32>
    %11 = arith.maximumf %9, %10 : vector<8x8x8xf32>
    %cst_7 = arith.constant 0.000000e+00 : f32
    %12 = vector.broadcast %cst_7 : f32 to vector<8x1x8xf32>
    %13 = vector.extract_strided_slice %11 {offsets = [0, 0, 0], sizes = [8, 7, 8], strides = [1, 1, 1]} : vector<8x8x8xf32> to vector<8x7x8xf32>
    %14 = tpu.concatenate %12, %13 in 1 : vector<8x1x8xf32>, vector<8x7x8xf32> -> vector<8x8x8xf32>
    %15 = vector.extract_strided_slice %11 {offsets = [0, 1, 0], sizes = [8, 7, 8], strides = [1, 1, 1]} : vector<8x8x8xf32> to vector<8x7x8xf32>
    %16 = tpu.concatenate %15, %12 in 1 : vector<8x7x8xf32>, vector<8x1x8xf32> -> vector<8x8x8xf32>
    %cst_8 = arith.constant 0.000000e+00 : f32
    %17 = vector.broadcast %cst_8 : f32 to vector<64x8xf32>
    %18 = vector.shape_cast %14 : vector<8x8x8xf32> to vector<64x8xf32>
    %c0_9 = arith.constant 0 : index
    %c0_10 = arith.constant 0 : index
    %c0_11 = arith.constant 0 : index
    %c0_12 = arith.constant 0 : index
    %19 = vector.load %arg4[%c0_9, %c0_10, %c0_11, %c0_12] : memref<3x3x8x8xf32, #tpu.memory_space<vmem>>, vector<1x1x8x8xf32>
    %20 = vector.shape_cast %19 : vector<1x1x8x8xf32> to vector<8x8xf32>
    %cst_13 = arith.constant dense<0.000000e+00> : vector<64x8xf32>
    %21 = tpu.matmul %18, %20, %cst_13 {dimension_numbers = #tpu.dot_dimension_numbers<[1], [0], [0], [1], [0, 0, 1, 1], [], []>} : vector<64x8xf32>, vector<8x8xf32>, vector<64x8xf32> -> vector<64x8xf32>
    %22 = arith.addf %17, %21 : vector<64x8xf32>
    %23 = vector.shape_cast %11 : vector<8x8x8xf32> to vector<64x8xf32>
    %c0_14 = arith.constant 0 : index
    %c1 = arith.constant 1 : index
    %c0_15 = arith.constant 0 : index
    %c0_16 = arith.constant 0 : index
    %24 = vector.load %arg4[%c0_14, %c1, %c0_15, %c0_16] : memref<3x3x8x8xf32, #tpu.memory_space<vmem>>, vector<1x1x8x8xf32>
    %25 = vector.shape_cast %24 : vector<1x1x8x8xf32> to vector<8x8xf32>
    %cst_17 = arith.constant dense<0.000000e+00> : vector<64x8xf32>
    %26 = tpu.matmul %23, %25, %cst_17 {dimension_numbers = #tpu.dot_dimension_numbers<[1], [0], [0], [1], [0, 0, 1, 1], [], []>} : vector<64x8xf32>, vector<8x8xf32>, vector<64x8xf32> -> vector<64x8xf32>
    %27 = arith.addf %22, %26 : vector<64x8xf32>
    %28 = vector.shape_cast %16 : vector<8x8x8xf32> to vector<64x8xf32>
    %c0_18 = arith.constant 0 : index
    %c2 = arith.constant 2 : index
    %c0_19 = arith.constant 0 : index
    %c0_20 = arith.constant 0 : index
    %29 = vector.load %arg4[%c0_18, %c2, %c0_19, %c0_20] : memref<3x3x8x8xf32, #tpu.memory_space<vmem>>, vector<1x1x8x8xf32>
    %30 = vector.shape_cast %29 : vector<1x1x8x8xf32> to vector<8x8xf32>
    %cst_21 = arith.constant dense<0.000000e+00> : vector<64x8xf32>
    %31 = tpu.matmul %28, %30, %cst_21 {dimension_numbers = #tpu.dot_dimension_numbers<[1], [0], [0], [1], [0, 0, 1, 1], [], []>} : vector<64x8xf32>, vector<8x8xf32>, vector<64x8xf32> -> vector<64x8xf32>
    %32 = arith.addf %27, %31 : vector<64x8xf32>
    %33 = vector.shape_cast %32 : vector<64x8xf32> to vector<8x8x8xf32>
    %cst_22 = arith.constant 0.000000e+00 : f32
    %34 = vector.broadcast %cst_22 : f32 to vector<64x8xf32>
    %35 = vector.shape_cast %14 : vector<8x8x8xf32> to vector<64x8xf32>
    %c1_23 = arith.constant 1 : index
    %c0_24 = arith.constant 0 : index
    %c0_25 = arith.constant 0 : index
    %c0_26 = arith.constant 0 : index
    %36 = vector.load %arg4[%c1_23, %c0_24, %c0_25, %c0_26] : memref<3x3x8x8xf32, #tpu.memory_space<vmem>>, vector<1x1x8x8xf32>
    %37 = vector.shape_cast %36 : vector<1x1x8x8xf32> to vector<8x8xf32>
    %cst_27 = arith.constant dense<0.000000e+00> : vector<64x8xf32>
    %38 = tpu.matmul %35, %37, %cst_27 {dimension_numbers = #tpu.dot_dimension_numbers<[1], [0], [0], [1], [0, 0, 1, 1], [], []>} : vector<64x8xf32>, vector<8x8xf32>, vector<64x8xf32> -> vector<64x8xf32>
    %39 = arith.addf %34, %38 : vector<64x8xf32>
    %40 = vector.shape_cast %11 : vector<8x8x8xf32> to vector<64x8xf32>
    %c1_28 = arith.constant 1 : index
    %c1_29 = arith.constant 1 : index
    %c0_30 = arith.constant 0 : index
    %c0_31 = arith.constant 0 : index
    %41 = vector.load %arg4[%c1_28, %c1_29, %c0_30, %c0_31] : memref<3x3x8x8xf32, #tpu.memory_space<vmem>>, vector<1x1x8x8xf32>
    %42 = vector.shape_cast %41 : vector<1x1x8x8xf32> to vector<8x8xf32>
    %cst_32 = arith.constant dense<0.000000e+00> : vector<64x8xf32>
    %43 = tpu.matmul %40, %42, %cst_32 {dimension_numbers = #tpu.dot_dimension_numbers<[1], [0], [0], [1], [0, 0, 1, 1], [], []>} : vector<64x8xf32>, vector<8x8xf32>, vector<64x8xf32> -> vector<64x8xf32>
    %44 = arith.addf %39, %43 : vector<64x8xf32>
    %45 = vector.shape_cast %16 : vector<8x8x8xf32> to vector<64x8xf32>
    %c1_33 = arith.constant 1 : index
    %c2_34 = arith.constant 2 : index
    %c0_35 = arith.constant 0 : index
    %c0_36 = arith.constant 0 : index
    %46 = vector.load %arg4[%c1_33, %c2_34, %c0_35, %c0_36] : memref<3x3x8x8xf32, #tpu.memory_space<vmem>>, vector<1x1x8x8xf32>
    %47 = vector.shape_cast %46 : vector<1x1x8x8xf32> to vector<8x8xf32>
    %cst_37 = arith.constant dense<0.000000e+00> : vector<64x8xf32>
    %48 = tpu.matmul %45, %47, %cst_37 {dimension_numbers = #tpu.dot_dimension_numbers<[1], [0], [0], [1], [0, 0, 1, 1], [], []>} : vector<64x8xf32>, vector<8x8xf32>, vector<64x8xf32> -> vector<64x8xf32>
    %49 = arith.addf %44, %48 : vector<64x8xf32>
    %50 = vector.shape_cast %49 : vector<64x8xf32> to vector<8x8x8xf32>
    %cst_38 = arith.constant 0.000000e+00 : f32
    %51 = vector.broadcast %cst_38 : f32 to vector<64x8xf32>
    %52 = vector.shape_cast %14 : vector<8x8x8xf32> to vector<64x8xf32>
    %c2_39 = arith.constant 2 : index
    %c0_40 = arith.constant 0 : index
    %c0_41 = arith.constant 0 : index
    %c0_42 = arith.constant 0 : index
    %53 = vector.load %arg4[%c2_39, %c0_40, %c0_41, %c0_42] : memref<3x3x8x8xf32, #tpu.memory_space<vmem>>, vector<1x1x8x8xf32>
    %54 = vector.shape_cast %53 : vector<1x1x8x8xf32> to vector<8x8xf32>
    %cst_43 = arith.constant dense<0.000000e+00> : vector<64x8xf32>
    %55 = tpu.matmul %52, %54, %cst_43 {dimension_numbers = #tpu.dot_dimension_numbers<[1], [0], [0], [1], [0, 0, 1, 1], [], []>} : vector<64x8xf32>, vector<8x8xf32>, vector<64x8xf32> -> vector<64x8xf32>
    %56 = arith.addf %51, %55 : vector<64x8xf32>
    %57 = vector.shape_cast %11 : vector<8x8x8xf32> to vector<64x8xf32>
    %c2_44 = arith.constant 2 : index
    %c1_45 = arith.constant 1 : index
    %c0_46 = arith.constant 0 : index
    %c0_47 = arith.constant 0 : index
    %58 = vector.load %arg4[%c2_44, %c1_45, %c0_46, %c0_47] : memref<3x3x8x8xf32, #tpu.memory_space<vmem>>, vector<1x1x8x8xf32>
    %59 = vector.shape_cast %58 : vector<1x1x8x8xf32> to vector<8x8xf32>
    %cst_48 = arith.constant dense<0.000000e+00> : vector<64x8xf32>
    %60 = tpu.matmul %57, %59, %cst_48 {dimension_numbers = #tpu.dot_dimension_numbers<[1], [0], [0], [1], [0, 0, 1, 1], [], []>} : vector<64x8xf32>, vector<8x8xf32>, vector<64x8xf32> -> vector<64x8xf32>
    %61 = arith.addf %56, %60 : vector<64x8xf32>
    %62 = vector.shape_cast %16 : vector<8x8x8xf32> to vector<64x8xf32>
    %c2_49 = arith.constant 2 : index
    %c2_50 = arith.constant 2 : index
    %c0_51 = arith.constant 0 : index
    %c0_52 = arith.constant 0 : index
    %63 = vector.load %arg4[%c2_49, %c2_50, %c0_51, %c0_52] : memref<3x3x8x8xf32, #tpu.memory_space<vmem>>, vector<1x1x8x8xf32>
    %64 = vector.shape_cast %63 : vector<1x1x8x8xf32> to vector<8x8xf32>
    %cst_53 = arith.constant dense<0.000000e+00> : vector<64x8xf32>
    %65 = tpu.matmul %62, %64, %cst_53 {dimension_numbers = #tpu.dot_dimension_numbers<[1], [0], [0], [1], [0, 0, 1, 1], [], []>} : vector<64x8xf32>, vector<8x8xf32>, vector<64x8xf32> -> vector<64x8xf32>
    %66 = arith.addf %61, %65 : vector<64x8xf32>
    %67 = vector.shape_cast %66 : vector<64x8xf32> to vector<8x8x8xf32>
    %cst_54 = arith.constant 0.000000e+00 : f32
    %68 = vector.broadcast %cst_54 : f32 to vector<1x8x8xf32>
    %69 = vector.extract_strided_slice %33 {offsets = [0, 0, 0], sizes = [7, 8, 8], strides = [1, 1, 1]} : vector<8x8x8xf32> to vector<7x8x8xf32>
    %70 = tpu.concatenate %68, %69 in 0 : vector<1x8x8xf32>, vector<7x8x8xf32> -> vector<8x8x8xf32>
    %71 = arith.addf %70, %50 : vector<8x8x8xf32>
    %72 = vector.extract_strided_slice %67 {offsets = [1, 0, 0], sizes = [7, 8, 8], strides = [1, 1, 1]} : vector<8x8x8xf32> to vector<7x8x8xf32>
    %73 = tpu.concatenate %72, %68 in 0 : vector<7x8x8xf32>, vector<1x8x8xf32> -> vector<8x8x8xf32>
    %74 = arith.addf %71, %73 : vector<8x8x8xf32>
    %75 = vector.shape_cast %74 : vector<8x8x8xf32> to vector<64x8xf32>
    %cst_55 = arith.constant dense<0.000000e+00> : vector<8xf32>
    %76 = vector.multi_reduction <add>, %75, %cst_55 [0] : vector<64x8xf32> to vector<8xf32>
    %77 = vector.shape_cast %76 : vector<8xf32> to vector<1x8xf32>
    %c0_56 = arith.constant 0 : index
    %c0_57 = arith.constant 0 : index
    %c0_58 = arith.constant 0 : index
    %78 = vector.load %arg6[%c0_56, %c0_57, %c0_58] : memref<1x2x8xf32, #tpu.memory_space<vmem>>, vector<1x1x8xf32>
    %79 = vector.shape_cast %78 : vector<1x1x8xf32> to vector<1x8xf32>
    %80 = vector.shape_cast %77 : vector<1x8xf32> to vector<1x1x8xf32>
    tpu.vector_store %arg6[%c0_56, %c0_57, %c0_58], %80 {strides = array<i32>} : memref<1x2x8xf32, #tpu.memory_space<vmem>>, vector<1x1x8xf32>,
    %81 = arith.mulf %75, %75 : vector<64x8xf32>
    %cst_59 = arith.constant dense<0.000000e+00> : vector<8xf32>
    %82 = vector.multi_reduction <add>, %81, %cst_59 [0] : vector<64x8xf32> to vector<8xf32>
    %83 = vector.shape_cast %82 : vector<8xf32> to vector<1x8xf32>
    %c0_60 = arith.constant 0 : index
    %c1_61 = arith.constant 1 : index
    %c0_62 = arith.constant 0 : index
    %84 = vector.load %arg6[%c0_60, %c1_61, %c0_62] : memref<1x2x8xf32, #tpu.memory_space<vmem>>, vector<1x1x8xf32>
    %85 = vector.shape_cast %84 : vector<1x1x8xf32> to vector<1x8xf32>
    %86 = vector.shape_cast %83 : vector<1x8xf32> to vector<1x1x8xf32>
    tpu.vector_store %arg6[%c0_60, %c1_61, %c0_62], %86 {strides = array<i32>} : memref<1x2x8xf32, #tpu.memory_space<vmem>>, vector<1x1x8xf32>,
    %c0_63 = arith.constant 0 : index
    %c0_64 = arith.constant 0 : index
    %c0_65 = arith.constant 0 : index
    %c0_66 = arith.constant 0 : index
    %87 = vector.load %arg5[%c0_63, %c0_64, %c0_65, %c0_66] : memref<1x8x8x8xf32, #tpu.memory_space<vmem>>, vector<1x8x8x8xf32>
    %88 = vector.shape_cast %87 : vector<1x8x8x8xf32> to vector<8x8x8xf32>
    %89 = vector.shape_cast %74 : vector<8x8x8xf32> to vector<1x8x8x8xf32>
    tpu.vector_store %arg5[%c0_63, %c0_64, %c0_65, %c0_66], %89 {strides = array<i32>} : memref<1x8x8x8xf32, #tpu.memory_space<vmem>>, vector<1x8x8x8xf32>,
    return
  }
  func.func @transform_0(%arg0: i32) -> (i32, i32, i32, i32) {
    %c0_i32 = arith.constant 0 : i32
    %c0_i32_0 = arith.constant 0 : i32
    %c0_i32_1 = arith.constant 0 : i32
    %c0_i32_2 = arith.constant 0 : i32
    return %arg0, %c0_i32, %c0_i32_0, %c0_i32_1 : i32, i32, i32, i32
  }
  func.func @transform_1(%arg0: i32) -> (i32, i32) {
    %c0_i32 = arith.constant 0 : i32
    %c0_i32_0 = arith.constant 0 : i32
    %c0_i32_1 = arith.constant 0 : i32
    return %c0_i32, %c0_i32_0 : i32, i32
  }
  func.func @transform_2(%arg0: i32) -> (i32, i32) {
    %c0_i32 = arith.constant 0 : i32
    %c0_i32_0 = arith.constant 0 : i32
    %c0_i32_1 = arith.constant 0 : i32
    return %c0_i32, %c0_i32_0 : i32, i32
  }
  func.func @transform_3(%arg0: i32) -> (i32, i32, i32, i32) {
    %c0_i32 = arith.constant 0 : i32
    %c0_i32_0 = arith.constant 0 : i32
    %c0_i32_1 = arith.constant 0 : i32
    %c0_i32_2 = arith.constant 0 : i32
    %c0_i32_3 = arith.constant 0 : i32
    return %c0_i32, %c0_i32_0, %c0_i32_1, %c0_i32_2 : i32, i32, i32, i32
  }
  func.func @transform_4(%arg0: i32) -> (i32, i32, i32, i32) {
    %c0_i32 = arith.constant 0 : i32
    %c0_i32_0 = arith.constant 0 : i32
    %c0_i32_1 = arith.constant 0 : i32
    %c0_i32_2 = arith.constant 0 : i32
    return %arg0, %c0_i32, %c0_i32_0, %c0_i32_1 : i32, i32, i32, i32
  }
  func.func @transform_5(%arg0: i32) -> (i32, i32, i32) {
    %c0_i32 = arith.constant 0 : i32
    %c0_i32_0 = arith.constant 0 : i32
    %c0_i32_1 = arith.constant 0 : i32
    return %arg0, %c0_i32, %c0_i32_0 : i32, i32, i32
  }
}

module attributes {stable_mosaic.version = 11 : i64} {
  func.func @kernel(%arg0: i32, %arg1: i32, %arg2: memref<1x8x8x8xf32, #tpu.memory_space<vmem>>, %arg3: memref<1x8xf32, #tpu.memory_space<vmem>>, %arg4: memref<1x8xf32, #tpu.memory_space<vmem>>, %arg5: memref<8x16xf32, #tpu.memory_space<vmem>>, %arg6: memref<1x8x8x16xf32, #tpu.memory_space<vmem>>, %arg7: memref<1x2x16xf32, #tpu.memory_space<vmem>>) attributes {dimension_semantics = [#tpu.dimension_semantics<parallel>, #tpu.dimension_semantics<arbitrary>], iteration_bounds = array<i64: 2, 1>, scalar_prefetch = 0 : i64, scratch_operands = 0 : i64, tpu.core_type = #tpu.core_type<tc>, window_params = [{transform_indices = @transform_0, window_bounds = array<i64: 1, 8, 8, 8>}, {pipeline_mode = #tpu.pipeline_mode<synchronous>, transform_indices = @transform_1, window_bounds = array<i64: 1, 8>}, {pipeline_mode = #tpu.pipeline_mode<synchronous>, transform_indices = @transform_2, window_bounds = array<i64: 1, 8>}, {pipeline_mode = #tpu.pipeline_mode<synchronous>, transform_indices = @transform_3, window_bounds = array<i64: 8, 16>}, {transform_indices = @transform_4, window_bounds = array<i64: 1, 8, 8, 16>}, {transform_indices = @transform_5, window_bounds = array<i64: 1, 2, 16>}]} {
    %c0 = arith.constant 0 : index
    %c0_0 = arith.constant 0 : index
    %0 = vector.load %arg3[%c0, %c0_0] : memref<1x8xf32, #tpu.memory_space<vmem>>, vector<1x8xf32>
    %1 = vector.shape_cast %0 : vector<1x8xf32> to vector<1x1x8xf32>
    %c0_1 = arith.constant 0 : index
    %c0_2 = arith.constant 0 : index
    %2 = vector.load %arg4[%c0_1, %c0_2] : memref<1x8xf32, #tpu.memory_space<vmem>>, vector<1x8xf32>
    %3 = vector.shape_cast %2 : vector<1x8xf32> to vector<1x1x8xf32>
    %c0_3 = arith.constant 0 : index
    %c0_4 = arith.constant 0 : index
    %c0_5 = arith.constant 0 : index
    %c0_6 = arith.constant 0 : index
    %4 = vector.load %arg2[%c0_3, %c0_4, %c0_5, %c0_6] : memref<1x8x8x8xf32, #tpu.memory_space<vmem>>, vector<1x8x8x8xf32>
    %5 = vector.shape_cast %4 : vector<1x8x8x8xf32> to vector<8x8x8xf32>
    %6 = vector.broadcast %1 : vector<1x1x8xf32> to vector<8x8x8xf32>
    %7 = arith.mulf %5, %6 : vector<8x8x8xf32>
    %8 = vector.broadcast %3 : vector<1x1x8xf32> to vector<8x8x8xf32>
    %9 = arith.addf %7, %8 : vector<8x8x8xf32>
    %cst = arith.constant 0.000000e+00 : f32
    %10 = vector.broadcast %cst : f32 to vector<8x8x8xf32>
    %11 = arith.maximumf %9, %10 : vector<8x8x8xf32>
    %12 = vector.shape_cast %11 : vector<8x8x8xf32> to vector<64x8xf32>
    %c0_7 = arith.constant 0 : index
    %c0_8 = arith.constant 0 : index
    %13 = vector.load %arg5[%c0_7, %c0_8] : memref<8x16xf32, #tpu.memory_space<vmem>>, vector<8x16xf32>
    %cst_9 = arith.constant dense<0.000000e+00> : vector<64x16xf32>
    %14 = tpu.matmul %12, %13, %cst_9 {dimension_numbers = #tpu.dot_dimension_numbers<[1], [0], [0], [1], [0, 0, 1, 1], [], []>} : vector<64x8xf32>, vector<8x16xf32>, vector<64x16xf32> -> vector<64x16xf32>
    %c0_i32 = arith.constant 0 : i32
    %15 = arith.cmpi eq, %arg1, %c0_i32 : i32
    %16 = arith.extui %15 : i1 to i32
    %c0_i32_10 = arith.constant 0 : i32
    %17 = arith.cmpi ne, %16, %c0_i32_10 : i32
    scf.if %17 {
      %cst_28 = arith.constant 0.000000e+00 : f32
      %39 = vector.broadcast %cst_28 : f32 to vector<1x2x16xf32>
      %c0_29 = arith.constant 0 : index
      %c0_30 = arith.constant 0 : index
      %c0_31 = arith.constant 0 : index
      %40 = vector.load %arg7[%c0_29, %c0_30, %c0_31] : memref<1x2x16xf32, #tpu.memory_space<vmem>>, vector<1x2x16xf32>
      tpu.vector_store %arg7[%c0_29, %c0_30, %c0_31], %39 {strides = array<i32>} : memref<1x2x16xf32, #tpu.memory_space<vmem>>, vector<1x2x16xf32>,
    } else {
    }
    %c0_11 = arith.constant 0 : index
    %c0_12 = arith.constant 0 : index
    %c0_13 = arith.constant 0 : index
    %18 = vector.load %arg7[%c0_11, %c0_12, %c0_13] : memref<1x2x16xf32, #tpu.memory_space<vmem>>, vector<1x1x16xf32>
    %19 = vector.shape_cast %18 : vector<1x1x16xf32> to vector<1x16xf32>
    %cst_14 = arith.constant dense<0.000000e+00> : vector<16xf32>
    %20 = vector.multi_reduction <add>, %14, %cst_14 [0] : vector<64x16xf32> to vector<16xf32>
    %21 = vector.shape_cast %20 : vector<16xf32> to vector<1x16xf32>
    %22 = arith.addf %19, %21 : vector<1x16xf32>
    %c0_15 = arith.constant 0 : index
    %c0_16 = arith.constant 0 : index
    %c0_17 = arith.constant 0 : index
    %23 = vector.load %arg7[%c0_15, %c0_16, %c0_17] : memref<1x2x16xf32, #tpu.memory_space<vmem>>, vector<1x1x16xf32>
    %24 = vector.shape_cast %23 : vector<1x1x16xf32> to vector<1x16xf32>
    %25 = vector.shape_cast %22 : vector<1x16xf32> to vector<1x1x16xf32>
    tpu.vector_store %arg7[%c0_15, %c0_16, %c0_17], %25 {strides = array<i32>} : memref<1x2x16xf32, #tpu.memory_space<vmem>>, vector<1x1x16xf32>,
    %c0_18 = arith.constant 0 : index
    %c1 = arith.constant 1 : index
    %c0_19 = arith.constant 0 : index
    %26 = vector.load %arg7[%c0_18, %c1, %c0_19] : memref<1x2x16xf32, #tpu.memory_space<vmem>>, vector<1x1x16xf32>
    %27 = vector.shape_cast %26 : vector<1x1x16xf32> to vector<1x16xf32>
    %28 = arith.mulf %14, %14 : vector<64x16xf32>
    %cst_20 = arith.constant dense<0.000000e+00> : vector<16xf32>
    %29 = vector.multi_reduction <add>, %28, %cst_20 [0] : vector<64x16xf32> to vector<16xf32>
    %30 = vector.shape_cast %29 : vector<16xf32> to vector<1x16xf32>
    %31 = arith.addf %27, %30 : vector<1x16xf32>
    %c0_21 = arith.constant 0 : index
    %c1_22 = arith.constant 1 : index
    %c0_23 = arith.constant 0 : index
    %32 = vector.load %arg7[%c0_21, %c1_22, %c0_23] : memref<1x2x16xf32, #tpu.memory_space<vmem>>, vector<1x1x16xf32>
    %33 = vector.shape_cast %32 : vector<1x1x16xf32> to vector<1x16xf32>
    %34 = vector.shape_cast %31 : vector<1x16xf32> to vector<1x1x16xf32>
    tpu.vector_store %arg7[%c0_21, %c1_22, %c0_23], %34 {strides = array<i32>} : memref<1x2x16xf32, #tpu.memory_space<vmem>>, vector<1x1x16xf32>,
    %35 = vector.shape_cast %14 : vector<64x16xf32> to vector<8x8x16xf32>
    %c0_24 = arith.constant 0 : index
    %c0_25 = arith.constant 0 : index
    %c0_26 = arith.constant 0 : index
    %c0_27 = arith.constant 0 : index
    %36 = vector.load %arg6[%c0_24, %c0_25, %c0_26, %c0_27] : memref<1x8x8x16xf32, #tpu.memory_space<vmem>>, vector<1x8x8x16xf32>
    %37 = vector.shape_cast %36 : vector<1x8x8x16xf32> to vector<8x8x16xf32>
    %38 = vector.shape_cast %35 : vector<8x8x16xf32> to vector<1x8x8x16xf32>
    tpu.vector_store %arg6[%c0_24, %c0_25, %c0_26, %c0_27], %38 {strides = array<i32>} : memref<1x8x8x16xf32, #tpu.memory_space<vmem>>, vector<1x8x8x16xf32>,
    return
  }
  func.func @transform_0(%arg0: i32, %arg1: i32) -> (i32, i32, i32, i32) {
    %c0_i32 = arith.constant 0 : i32
    %c0_i32_0 = arith.constant 0 : i32
    %c0_i32_1 = arith.constant 0 : i32
    return %arg0, %arg1, %c0_i32, %c0_i32_0 : i32, i32, i32, i32
  }
  func.func @transform_1(%arg0: i32, %arg1: i32) -> (i32, i32) {
    %c0_i32 = arith.constant 0 : i32
    %c0_i32_0 = arith.constant 0 : i32
    %c0_i32_1 = arith.constant 0 : i32
    return %c0_i32, %c0_i32_0 : i32, i32
  }
  func.func @transform_2(%arg0: i32, %arg1: i32) -> (i32, i32) {
    %c0_i32 = arith.constant 0 : i32
    %c0_i32_0 = arith.constant 0 : i32
    %c0_i32_1 = arith.constant 0 : i32
    return %c0_i32, %c0_i32_0 : i32, i32
  }
  func.func @transform_3(%arg0: i32, %arg1: i32) -> (i32, i32) {
    %c0_i32 = arith.constant 0 : i32
    %c0_i32_0 = arith.constant 0 : i32
    %c0_i32_1 = arith.constant 0 : i32
    return %c0_i32, %c0_i32_0 : i32, i32
  }
  func.func @transform_4(%arg0: i32, %arg1: i32) -> (i32, i32, i32, i32) {
    %c0_i32 = arith.constant 0 : i32
    %c0_i32_0 = arith.constant 0 : i32
    %c0_i32_1 = arith.constant 0 : i32
    return %arg0, %arg1, %c0_i32, %c0_i32_0 : i32, i32, i32, i32
  }
  func.func @transform_5(%arg0: i32, %arg1: i32) -> (i32, i32, i32) {
    %c0_i32 = arith.constant 0 : i32
    %c0_i32_0 = arith.constant 0 : i32
    %c0_i32_1 = arith.constant 0 : i32
    return %arg0, %c0_i32, %c0_i32_0 : i32, i32, i32
  }
}

module attributes {stable_mosaic.version = 11 : i64} {
  func.func @kernel(%arg0: i32, %arg1: i32, %arg2: memref<1x8x8x16xf32, #tpu.memory_space<vmem>>, %arg3: memref<1x8x8x16xf32, #tpu.memory_space<vmem>>, %arg4: memref<1x16xf32, #tpu.memory_space<vmem>>, %arg5: memref<1x16xf32, #tpu.memory_space<vmem>>, %arg6: memref<1x16xf32, #tpu.memory_space<vmem>>, %arg7: memref<1x16xf32, #tpu.memory_space<vmem>>, %arg8: memref<1x8x8x16xf32, #tpu.memory_space<vmem>>) attributes {dimension_semantics = [#tpu.dimension_semantics<parallel>, #tpu.dimension_semantics<parallel>], iteration_bounds = array<i64: 2, 1>, scalar_prefetch = 0 : i64, scratch_operands = 0 : i64, tpu.core_type = #tpu.core_type<tc>, window_params = [{transform_indices = @transform_0, window_bounds = array<i64: 1, 8, 8, 16>}, {transform_indices = @transform_1, window_bounds = array<i64: 1, 8, 8, 16>}, {pipeline_mode = #tpu.pipeline_mode<synchronous>, transform_indices = @transform_2, window_bounds = array<i64: 1, 16>}, {pipeline_mode = #tpu.pipeline_mode<synchronous>, transform_indices = @transform_3, window_bounds = array<i64: 1, 16>}, {pipeline_mode = #tpu.pipeline_mode<synchronous>, transform_indices = @transform_4, window_bounds = array<i64: 1, 16>}, {pipeline_mode = #tpu.pipeline_mode<synchronous>, transform_indices = @transform_5, window_bounds = array<i64: 1, 16>}, {transform_indices = @transform_6, window_bounds = array<i64: 1, 8, 8, 16>}]} {
    %c0 = arith.constant 0 : index
    %c0_0 = arith.constant 0 : index
    %c0_1 = arith.constant 0 : index
    %c0_2 = arith.constant 0 : index
    %0 = vector.load %arg2[%c0, %c0_0, %c0_1, %c0_2] : memref<1x8x8x16xf32, #tpu.memory_space<vmem>>, vector<1x8x8x16xf32>
    %1 = vector.shape_cast %0 : vector<1x8x8x16xf32> to vector<8x8x16xf32>
    %c0_3 = arith.constant 0 : index
    %c0_4 = arith.constant 0 : index
    %2 = vector.load %arg4[%c0_3, %c0_4] : memref<1x16xf32, #tpu.memory_space<vmem>>, vector<1x16xf32>
    %3 = vector.shape_cast %2 : vector<1x16xf32> to vector<1x1x16xf32>
    %4 = vector.broadcast %3 : vector<1x1x16xf32> to vector<8x8x16xf32>
    %5 = arith.mulf %1, %4 : vector<8x8x16xf32>
    %c0_5 = arith.constant 0 : index
    %c0_6 = arith.constant 0 : index
    %6 = vector.load %arg5[%c0_5, %c0_6] : memref<1x16xf32, #tpu.memory_space<vmem>>, vector<1x16xf32>
    %7 = vector.shape_cast %6 : vector<1x16xf32> to vector<1x1x16xf32>
    %8 = vector.broadcast %7 : vector<1x1x16xf32> to vector<8x8x16xf32>
    %9 = arith.addf %5, %8 : vector<8x8x16xf32>
    %c0_7 = arith.constant 0 : index
    %c0_8 = arith.constant 0 : index
    %c0_9 = arith.constant 0 : index
    %c0_10 = arith.constant 0 : index
    %10 = vector.load %arg3[%c0_7, %c0_8, %c0_9, %c0_10] : memref<1x8x8x16xf32, #tpu.memory_space<vmem>>, vector<1x8x8x16xf32>
    %11 = vector.shape_cast %10 : vector<1x8x8x16xf32> to vector<8x8x16xf32>
    %c0_11 = arith.constant 0 : index
    %c0_12 = arith.constant 0 : index
    %12 = vector.load %arg6[%c0_11, %c0_12] : memref<1x16xf32, #tpu.memory_space<vmem>>, vector<1x16xf32>
    %13 = vector.shape_cast %12 : vector<1x16xf32> to vector<1x1x16xf32>
    %14 = vector.broadcast %13 : vector<1x1x16xf32> to vector<8x8x16xf32>
    %15 = arith.mulf %11, %14 : vector<8x8x16xf32>
    %c0_13 = arith.constant 0 : index
    %c0_14 = arith.constant 0 : index
    %16 = vector.load %arg7[%c0_13, %c0_14] : memref<1x16xf32, #tpu.memory_space<vmem>>, vector<1x16xf32>
    %17 = vector.shape_cast %16 : vector<1x16xf32> to vector<1x1x16xf32>
    %18 = vector.broadcast %17 : vector<1x1x16xf32> to vector<8x8x16xf32>
    %19 = arith.addf %15, %18 : vector<8x8x16xf32>
    %20 = arith.addf %9, %19 : vector<8x8x16xf32>
    %cst = arith.constant 0.000000e+00 : f32
    %21 = vector.broadcast %cst : f32 to vector<8x8x16xf32>
    %22 = arith.maximumf %20, %21 : vector<8x8x16xf32>
    %c0_15 = arith.constant 0 : index
    %c0_16 = arith.constant 0 : index
    %c0_17 = arith.constant 0 : index
    %c0_18 = arith.constant 0 : index
    %23 = vector.load %arg8[%c0_15, %c0_16, %c0_17, %c0_18] : memref<1x8x8x16xf32, #tpu.memory_space<vmem>>, vector<1x8x8x16xf32>
    %24 = vector.shape_cast %23 : vector<1x8x8x16xf32> to vector<8x8x16xf32>
    %25 = vector.shape_cast %22 : vector<8x8x16xf32> to vector<1x8x8x16xf32>
    tpu.vector_store %arg8[%c0_15, %c0_16, %c0_17, %c0_18], %25 {strides = array<i32>} : memref<1x8x8x16xf32, #tpu.memory_space<vmem>>, vector<1x8x8x16xf32>,
    return
  }
  func.func @transform_0(%arg0: i32, %arg1: i32) -> (i32, i32, i32, i32) {
    %c0_i32 = arith.constant 0 : i32
    %c0_i32_0 = arith.constant 0 : i32
    %c0_i32_1 = arith.constant 0 : i32
    return %arg0, %arg1, %c0_i32, %c0_i32_0 : i32, i32, i32, i32
  }
  func.func @transform_1(%arg0: i32, %arg1: i32) -> (i32, i32, i32, i32) {
    %c0_i32 = arith.constant 0 : i32
    %c0_i32_0 = arith.constant 0 : i32
    %c0_i32_1 = arith.constant 0 : i32
    return %arg0, %arg1, %c0_i32, %c0_i32_0 : i32, i32, i32, i32
  }
  func.func @transform_2(%arg0: i32, %arg1: i32) -> (i32, i32) {
    %c0_i32 = arith.constant 0 : i32
    %c0_i32_0 = arith.constant 0 : i32
    %c0_i32_1 = arith.constant 0 : i32
    return %c0_i32, %c0_i32_0 : i32, i32
  }
  func.func @transform_3(%arg0: i32, %arg1: i32) -> (i32, i32) {
    %c0_i32 = arith.constant 0 : i32
    %c0_i32_0 = arith.constant 0 : i32
    %c0_i32_1 = arith.constant 0 : i32
    return %c0_i32, %c0_i32_0 : i32, i32
  }
  func.func @transform_4(%arg0: i32, %arg1: i32) -> (i32, i32) {
    %c0_i32 = arith.constant 0 : i32
    %c0_i32_0 = arith.constant 0 : i32
    %c0_i32_1 = arith.constant 0 : i32
    return %c0_i32, %c0_i32_0 : i32, i32
  }
  func.func @transform_5(%arg0: i32, %arg1: i32) -> (i32, i32) {
    %c0_i32 = arith.constant 0 : i32
    %c0_i32_0 = arith.constant 0 : i32
    %c0_i32_1 = arith.constant 0 : i32
    return %c0_i32, %c0_i32_0 : i32, i32
  }
  func.func @transform_6(%arg0: i32, %arg1: i32) -> (i32, i32, i32, i32) {
    %c0_i32 = arith.constant 0 : i32
    %c0_i32_0 = arith.constant 0 : i32
    %c0_i32_1 = arith.constant 0 : i32
    return %arg0, %arg1, %c0_i32, %c0_i32_0 : i32, i32, i32, i32
  }
}

</mosaic_0001>

<bundles_post_ra>
// kernel: block_forward_pallas.4
= control target key start
LH: loop header
LB: loop body
LE: loop exit
PB: predicated region body
PF: predicated region fallthrough
CT: control target
= control target key end

     0   :  { %s824_s15 = smov 0   ;;  %s826_s16 = smov 0   ;;  %s936_s0 = inlined_call_operand.vmem [shape: f32[2,8,8,4], index: 0, kind: input, shape index: {}]   ;;  %s937_s1 = inlined_call_operand.vmem [shape: f32[4,24], index: 1, kind: input, shape index: {}]   ;;  %s938_s2 = inlined_call_operand.vmem [shape: f32[2,8,8,8], index: 2, kind: output, shape index: {0}]   ;;  %s939_s3 = inlined_call_operand.vmem [shape: f32[2,8,8,16], index: 3, kind: output, shape index: {1}]   ;;  %s940_s4 = inlined_call_operand.vmem [shape: f32[2,2,24], index: 4, kind: output, shape index: {2}]  }
   0x1   :  { %s828_s17 = smov 0  }
   0x2 LB: > { %s27_s18 = sadd.s32 1, %s791_s16  ;;  %p700_p0 = scmp.ge.s32.totalorder %s795_s17, 1  ;;  %s795_s17 = sphi %s828_s17, %s15_s17   ;;  %s791_s16 = sphi %s826_s16, %s942_s16   ;;  %s787_s15 = sphi %s824_s15, %s941_s15  }
   0x3   : > { %p29_p1 = scmp.ge.s32.totalorder %s27_s18, 2  ;;  %p190_p2 = scmp.lt.s32.totalorder %s795_s17, 3 }
   0x5   : > { %s944_s18 = smov (%p29_p1, %s27_s18), 0  ;;  %p191_p3 = pnand %p700_p0, %p190_p2 }
   0x6   : > { %v279_v0 = vld [vmem:[%s937_s1] sm:$0xf] (!%p191_p3)  ;;  %vm305_vm0 = vcmask (!%p191_p3), 1043456   ;;  %p238_p4 = scmp.lt.s32.totalorder (!%p191_p3), %s787_s15, 1  ;;  %vm280_vm1 = vcmask (!%p191_p3), 31744   ;;  %vm418_vm2 = vcmask (!%p191_p3), 189440  }
   0x7   : > { %194 = sbr.rel (%p191_p3) target bundleno = 360 (0x168), region = 28  ;;  %731 = vmatprep.subr.msk.mxu0 (!%p191_p3), %vm305_vm0, %v279_v0  ;;  %745 = vmatprep.subr.msk.mxu1 (!%p191_p3), %vm305_vm0, %v279_v0  ;;  %v797_v9 = vmov (!%p191_p3), 0.0   ;;  %vm421_vm3 = vcmask (!%p191_p3), 195584   ;;  %vm478_vm4 = vcmask (!%p191_p3), 64512   ;;  %s798_s6 = smov (!%p191_p3), 120   ;;  %vm444_vm5 = vcmask (!%p191_p3), 188416  }
   0x8   : > { %732 = vmatpush3.msk.msra.mxu0 (!%p191_p3), %vm305_vm0, %v279_v0  ;;  %746 = vmatpush3.msk.msra.mxu1 (!%p191_p3), %vm305_vm0, %v279_v0  ;;  %vm519_vm6 = vcmask (!%p191_p3), 130048  }
   0xe   : > { %s946_s15 = smov (!%p238_p4, %s787_s15), 1 }
   0xf   : > { %s845_s21 = sshll.u32 %s946_s15, 6  ;;  %s707_s25 = sshll.u32 %s946_s15, 1 }
  0x10   : > { %s245_s24 = scalar_lea.vmem %s936_s0, %s845_s21  ;;  %s862_s28 = scalar_lea.vmem %s940_s4, %s707_s25 }
  0x11   : > { %v271_v1 = vld [vmem:[%s245_s24] sm:$0xff]  ;;  %v272_v3 = vld [vmem:[%s245_s24 + $0x8] sm:$0xff]  ;;  %v273_v5 = vld [vmem:[%s245_s24 + $0x10] sm:$0xff]  ;;  %419 = vst.msk [vmem:[%s862_s28] sm:$0x3] %vm418_vm2, %v797_v9  ;;  %s869_s5 = scalar_lea.vmem %s938_s2, %s845_s21  ;;  %s265_s9 = scalar_lea.vmem %s939_s3, %s845_s21 }
  0x12   : > { %v275_v2 = vld [vmem:[%s245_s24 + $0x20] sm:$0xff]  ;;  %733 = vmatprep.mubr.msk.f32.mxu0 %vm280_vm1, %v271_v1  ;;  %v276_v4 = vld [vmem:[%s245_s24 + $0x28] sm:$0xff]  ;;  %v277_v6 = vld [vmem:[%s245_s24 + $0x30] sm:$0xff] }
  0x13   : > { %739 = vmatprep.mubr.msk.f32.mxu1 %vm280_vm1, %v275_v2  ;;  %734 = vmatmul.mubr.msk.f32.vlgmr.msra.gmra.mrb[0].mxu0 %vm280_vm1, %v272_v3  ;;  %v274_v7 = vld [vmem:[%s245_s24 + $0x18] sm:$0xff] }
  0x14   : > { %740 = vmatmul.mubr.msk.f32.vlgmr.msra.gmra.mrb[0].mxu1 %vm280_vm1, %v276_v4  ;;  %736 = vmatprep.mubr.msk.f32.mxu0 %vm280_vm1, %v273_v5  ;;  %v278_v8 = vld [vmem:[%s245_s24 + $0x38] sm:$0xff] }
  0x15   : > { %742 = vmatprep.mubr.msk.f32.mxu1 %vm280_vm1, %v277_v6 }
  0x17   : > { %737 = vmatmul.mubr.msk.f32.gmra.mrb[2].mxu0 %vm280_vm1, %v274_v7 }
  0x18   : > { %743 = vmatmul.mubr.msk.f32.gmra.mrb[2].mxu1 %vm280_vm1, %v278_v8  ;;  %v420_v1 = vld [vmem:[%s862_s28] sm:$0x1]  ;;  %v446_v4 = vld [vmem:[%s862_s28 + $0x1] sm:$0x1] }
  0xe6   : > { %v735_v10 = vpop.f32.mrb[0].mxu0 }
  0xe7   : > { %v741_v11 = vpop.f32.mrb[0].mxu1  ;;  %v423_v12 = vsel %vm421_vm3, %v735_v10, 0.0  ;;  %v448_v13 = vmul.f32 %v735_v10, %v735_v10  ;;  %480 = vst.msk [vmem:[%s869_s5 + $0x8] sm:$0xff] %vm478_vm4, %v735_v10  ;;  %497 = vrot.lane.b32.xlu0 %v735_v10, %s798_s6  ;;  %v375_v15 = vpop.f32.mrb[1].mxu0 }
  0xe8   : > { %484 = vst.msk [vmem:[%s869_s5 + $0x28] sm:$0xff] %vm478_vm4, %v741_v11  ;;  %505 = vrot.lane.b32.xlu1 %v741_v11, %s798_s6  ;;  %v395_v14 = vpop.f32.mrb[1].mxu1  ;;  %v422_v16 = vsel %vm421_vm3, %v375_v15, 0.0  ;;  %v447_v17 = vmul.f32 %v375_v15, %v375_v15  ;;  %479 = vst.msk [vmem:[%s869_s5] sm:$0xff] %vm478_vm4, %v375_v15  ;;  %v452_v35 = vmul.f32 %v741_v11, %v741_v11  ;;  %v431_v40 = vsel %vm421_vm3, %v741_v11, 0.0 }
  0xe9   : > { %483 = vst.msk [vmem:[%s869_s5 + $0x20] sm:$0xff] %vm478_vm4, %v395_v14  ;;  %v456_v18 = vsel %vm421_vm3, %v448_v13, 0.0  ;;  %v424_v19 = vadd.f32 %v423_v12, %v422_v16  ;;  %v451_v30 = vmul.f32 %v395_v14, %v395_v14  ;;  %v429_v36 = vsel %vm421_vm3, %v395_v14, 0.0 }
  0xea   : > { %v455_v20 = vsel %vm421_vm3, %v447_v17, 0.0  ;;  %v738_v21 = vpop.f32.mrb[2].mxu0  ;;  %v464_v45 = vsel %vm421_vm3, %v452_v35, 0.0 }
  0xeb   : > { %v744_v22 = vpop.f32.mrb[2].mxu1  ;;  %482 = vst.msk [vmem:[%s869_s5 + $0x18] sm:$0xff] %vm478_vm4, %v738_v21  ;;  %495 = vrot.lane.b32.xlu0 %v375_v15, %s798_s6  ;;  %v385_v23 = vpop.f32.mrb[3].mxu0  ;;  %v457_v24 = vadd.f32 %v456_v18, %v455_v20  ;;  %v450_v26 = vmul.f32 %v738_v21, %v738_v21  ;;  %v427_v31 = vsel %vm421_vm3, %v738_v21, 0.0  ;;  %v462_v41 = vsel %vm421_vm3, %v451_v30, 0.0 }
  0xec   : > { %501 = vrot.lane.b32.xlu1 %v738_v21, %s798_s6  ;;  %486 = vst.msk [vmem:[%s869_s5 + $0x38] sm:$0xff] %vm478_vm4, %v744_v22  ;;  %v405_v25 = vpop.f32.mrb[3].mxu1  ;;  %v425_v27 = vsel %vm421_vm3, %v385_v23, 0.0  ;;  %v449_v28 = vmul.f32 %v385_v23, %v385_v23  ;;  %481 = vst.msk [vmem:[%s869_s5 + $0x10] sm:$0xff] %vm478_vm4, %v385_v23  ;;  %v454_v46 = vmul.f32 %v744_v22, %v744_v22  ;;  %v435_v50 = vsel %vm421_vm3, %v744_v22, 0.0 }
  0xed   : > { %485 = vst.msk [vmem:[%s869_s5 + $0x30] sm:$0xff] %vm478_vm4, %v405_v25  ;;  %v426_v29 = vadd.f32 %v425_v27, %v424_v19  ;;  %v460_v37 = vsel %vm421_vm3, %v450_v26, 0.0  ;;  %v453_v42 = vmul.f32 %v405_v25, %v405_v25  ;;  %v433_v47 = vsel %vm421_vm3, %v405_v25, 0.0 }
  0xee   : > { %v458_v32 = vsel %vm421_vm3, %v449_v28, 0.0  ;;  %v468_v54 = vsel %vm421_vm3, %v454_v46, 0.0 }
  0xef   : > { %v428_v33 = vadd.f32 %v427_v31, %v426_v29  ;;  %v459_v34 = vadd.f32 %v458_v32, %v457_v24  ;;  %503 = vrot.lane.b32.xlu0 %v395_v14, %s798_s6  ;;  %v466_v51 = vsel %vm421_vm3, %v453_v42, 0.0 }
  0xf0   : > { %499 = vrot.lane.b32.xlu1 %v385_v23, %s798_s6 }
  0xf1   : > { %v461_v38 = vadd.f32 %v460_v37, %v459_v34  ;;  %v430_v39 = vadd.f32 %v429_v36, %v428_v33 }
  0xf3   : > { %v432_v43 = vadd.f32 %v431_v40, %v430_v39  ;;  %v463_v44 = vadd.f32 %v462_v41, %v461_v38  ;;  %507 = vrot.lane.b32.xlu0 %v405_v25, %s798_s6 }
  0xf4   : > { %509 = vrot.lane.b32.xlu1 %v744_v22, %s798_s6 }
  0xf5   : > { %v434_v48 = vadd.f32 %v433_v47, %v432_v43  ;;  %v465_v49 = vadd.f32 %v464_v45, %v463_v44 }
  0xf7   : > { %v436_v52 = vadd.f32 %v435_v50, %v434_v48  ;;  %v467_v53 = vadd.f32 %v466_v51, %v465_v49 }
  0xf9   : > { %v437_v55 = vrot.slane %v436_v52, 4  ;;  %v469_v56 = vadd.f32 %v468_v54, %v467_v53 }
  0xfb   : > { %v438_v57 = vadd.f32 %v437_v55, %v436_v52  ;;  %v470_v58 = vrot.slane %v469_v56, 4 }
  0xfd   : > { %v439_v59 = vrot.slane %v438_v57, 2  ;;  %v471_v60 = vadd.f32 %v470_v58, %v469_v56 }
  0xff   : > { %v440_v61 = vadd.f32 %v439_v59, %v438_v57  ;;  %v472_v62 = vrot.slane %v471_v60, 2 }
 0x101   : > { %v441_v63 = vrot.slane %v440_v61, 1  ;;  %v473_v0 = vadd.f32 %v472_v62, %v471_v60 }
 0x103   : > { %v442_v2 = vadd.f32 %v441_v63, %v440_v61  ;;  %v474_v3 = vrot.slane %v473_v0, 1 }
 0x105   : > { %v443_v5 = vadd.f32 %v442_v2, %v420_v1  ;;  %v475_v6 = vadd.f32 %v474_v3, %v473_v0 }
 0x107   : > { %445 = vst.msk [vmem:[%s862_s28] sm:$0x1] %vm444_vm5, %v443_v5  ;;  %v476_v7 = vadd.f32 %v475_v6, %v446_v4 }
 0x109   : > { %477 = vst.msk [vmem:[%s862_s28 + $0x1] sm:$0x1] %vm444_vm5, %v476_v7 }
 0x159   : > { %v498_v9 = vpop.permute.xlu0 %497 }
 0x15a   : > { %v506_v8 = vpop.permute.xlu1 %505  ;;  %521 = vst.msk [vmem:[%s265_s9 + $0x8] sm:$0xff] %vm519_vm6, %v498_v9 }
 0x15b   : > { %525 = vst.msk [vmem:[%s265_s9 + $0x28] sm:$0xff] %vm519_vm6, %v506_v8 }
 0x15d   : > { %v496_v10 = vpop.permute.xlu0 %495 }
 0x15e   : > { %v502_v11 = vpop.permute.xlu1 %501  ;;  %520 = vst.msk [vmem:[%s265_s9] sm:$0xff] %vm519_vm6, %v496_v10 }
 0x15f   : > { %523 = vst.msk [vmem:[%s265_s9 + $0x18] sm:$0xff] %vm519_vm6, %v502_v11 }
 0x161   : > { %v504_v12 = vpop.permute.xlu0 %503 }
 0x162   : > { %v500_v13 = vpop.permute.xlu1 %499  ;;  %524 = vst.msk [vmem:[%s265_s9 + $0x20] sm:$0xff] %vm519_vm6, %v504_v12 }
 0x163   : > { %522 = vst.msk [vmem:[%s265_s9 + $0x10] sm:$0xff] %vm519_vm6, %v500_v13 }
 0x165   : > { %v508_v14 = vpop.permute.xlu0 %507 }
 0x166   : > { %v510_v15 = vpop.permute.xlu1 %509  ;;  %526 = vst.msk [vmem:[%s265_s9 + $0x30] sm:$0xff] %vm519_vm6, %v508_v14 }
 0x167   : > { %527 = vst.msk [vmem:[%s265_s9 + $0x38] sm:$0xff] %vm519_vm6, %v510_v15 }
 0x168 PF: > { %s15_s17 = sadd.s32 1, %s795_s17   ;;  %s941_s15 = smov %s791_s16 }
 0x169   : > { %p12_p5 = scmp.ge.s32.totalorder %s15_s17, 4   ;;  %s942_s16 = smov %s944_s18 }
 0x16b   :  { %14 = sbr.rel (!%p12_p5) target bundleno = 2 (0x2), region = 86 }

// kernel: block_forward_pallas.6
= control target key start
LH: loop header
LB: loop body
LE: loop exit
PB: predicated region body
PF: predicated region fallthrough
CT: control target
= control target key end

     0   :  { %s771_s18 = smov 0   ;;  %s773_s19 = smov 0   ;;  %s863_s0 = inlined_call_operand.vmem [shape: f32[2,8,8,8], index: 0, kind: input, shape index: {}]   ;;  %s864_s1 = inlined_call_operand.vmem [shape: f32[1,8], index: 1, kind: input, shape index: {}]   ;;  %s865_s2 = inlined_call_operand.vmem [shape: f32[1,8], index: 2, kind: input, shape index: {}]   ;;  %s866_s3 = inlined_call_operand.vmem [shape: f32[8,16], index: 3, kind: input, shape index: {}]   ;;  %s867_s4 = inlined_call_operand.vmem [shape: f32[2,8,8,16], index: 4, kind: output, shape index: {0}]   ;;  %s868_s5 = inlined_call_operand.vmem [shape: f32[2,2,16], index: 5, kind: output, shape index: {1}]  }
   0x1   :  { %s775_s20 = smov 0  }
   0x2 LB: > { %s28_s21 = sadd.s32 1, %s734_s19  ;;  %p646_p0 = scmp.ge.s32.totalorder %s738_s20, 1  ;;  %s738_s20 = sphi %s775_s20, %s16_s20   ;;  %s734_s19 = sphi %s773_s19, %s870_s19   ;;  %s730_s18 = sphi %s771_s18, %s869_s18  }
   0x3   : > { %p30_p1 = scmp.ge.s32.totalorder %s28_s21, 2  ;;  %p211_p2 = scmp.lt.s32.totalorder %s738_s20, 3 }
   0x5   : > { %s872_s21 = smov (%p30_p1, %s28_s21), 0  ;;  %p212_p3 = pnand %p646_p0, %p211_p2 }
   0x6   : > { %v321_v0 = vld [vmem:[%s866_s3] sm:$0xff] (!%p212_p3)  ;;  %p252_p4 = scmp.lt.s32.totalorder (!%p212_p3), %s730_s18, 1  ;;  %vm322_vm0 = vcmask (!%p212_p3), 64512   ;;  %vm456_vm1 = vcmask (!%p212_p3), 123904   ;;  %v740_v35 = vmov (!%p212_p3), 0.0   ;;  %vm459_vm2 = vcmask (!%p212_p3), 130048  }
   0x7   : > { %215 = sbr.rel (%p212_p3) target bundleno = 272 (0x110), region = 36  ;;  %675 = vmatprep.subr.mxu0 (!%p212_p3), %v321_v0  ;;  %689 = vmatprep.subr.mxu1 (!%p212_p3), %v321_v0  ;;  %v652_v1 = vld [vmem:[%s864_s1] ss:$0 sm:$0xff] (!%p212_p3)  ;;  %vm482_vm3 = vcmask (!%p212_p3), 122880  }
   0x8   : > { %676 = vmatpush3.msra.mxu0 (!%p212_p3), %v321_v0  ;;  %690 = vmatpush3.msra.mxu1 (!%p212_p3), %v321_v0  ;;  %v653_v2 = vld [vmem:[%s865_s2] ss:$0 sm:$0xff] (!%p212_p3) }
   0xe   : > { %s874_s18 = smov (!%p252_p4, %s730_s18), 1 }
   0xf   : > { %s664_s24 = sshll.u32 %s874_s18, 6  ;;  %s651_s7 = sshll.u32 %s874_s18, 1 }
  0x10   : > { %s259_s29 = scalar_lea.vmem %s863_s0, %s664_s24  ;;  %s818_s10 = scalar_lea.vmem %s868_s5, %s651_s7 }
  0x11   : > { %v277_v3 = vld [vmem:[%s259_s29] sm:$0xff]  ;;  %v278_v4 = vld [vmem:[%s259_s29 + $0x8] sm:$0xff]  ;;  %v279_v5 = vld [vmem:[%s259_s29 + $0x10] sm:$0xff]  ;;  %457 = vst.msk [vmem:[%s818_s10] sm:$0x3] %vm456_vm1, %v740_v35  ;;  %s269_s13 = scalar_lea.vmem %s867_s4, %s664_s24 }
  0x12   : > { %v291_v6 = vmul.f32 %v652_v1, %v277_v3  ;;  %v292_v7 = vmul.f32 %v652_v1, %v278_v4  ;;  %v293_v8 = vmul.f32 %v652_v1, %v279_v5  ;;  %v280_v9 = vld [vmem:[%s259_s29 + $0x18] sm:$0xff]  ;;  %v281_v10 = vld [vmem:[%s259_s29 + $0x20] sm:$0xff]  ;;  %v282_v11 = vld [vmem:[%s259_s29 + $0x28] sm:$0xff] }
  0x13   : > { %v294_v12 = vmul.f32 %v652_v1, %v280_v9  ;;  %v295_v13 = vmul.f32 %v652_v1, %v281_v10  ;;  %v296_v14 = vmul.f32 %v652_v1, %v282_v11  ;;  %v283_v15 = vld [vmem:[%s259_s29 + $0x30] sm:$0xff]  ;;  %v284_v16 = vld [vmem:[%s259_s29 + $0x38] sm:$0xff] }
  0x14   : > { %v305_v17 = vadd.f32 %v653_v2, %v291_v6  ;;  %v306_v18 = vadd.f32 %v653_v2, %v292_v7  ;;  %v307_v19 = vadd.f32 %v653_v2, %v293_v8  ;;  %v297_v20 = vmul.f32 %v652_v1, %v283_v15 }
  0x15   : > { %v308_v21 = vadd.f32 %v653_v2, %v294_v12  ;;  %v309_v22 = vadd.f32 %v653_v2, %v295_v13  ;;  %v310_v23 = vadd.f32 %v653_v2, %v296_v14  ;;  %v298_v24 = vmul.f32 %v652_v1, %v284_v16 }
  0x16   : > { %v313_v25 = vmax.f32 %v305_v17, 0.0  ;;  %v314_v26 = vmax.f32 %v306_v18, 0.0  ;;  %v315_v27 = vmax.f32 %v307_v19, 0.0  ;;  %v311_v28 = vadd.f32 %v653_v2, %v297_v20 }
  0x17   : > { %v317_v29 = vmax.f32 %v309_v22, 0.0  ;;  %v318_v30 = vmax.f32 %v310_v23, 0.0  ;;  %v312_v31 = vadd.f32 %v653_v2, %v298_v24  ;;  %v316_v33 = vmax.f32 %v308_v21, 0.0 }
  0x18   : > { %677 = vmatprep.mubr.msk.f32.mxu0 %vm322_vm0, %v313_v25  ;;  %v319_v32 = vmax.f32 %v311_v28, 0.0 }
  0x19   : > { %678 = vmatmul.mubr.msk.f32.vlgmr.msra.gmra.mrb[0].mxu0 %vm322_vm0, %v314_v26  ;;  %683 = vmatprep.mubr.msk.f32.mxu1 %vm322_vm0, %v317_v29  ;;  %v320_v34 = vmax.f32 %v312_v31, 0.0 }
  0x1a   : > { %680 = vmatprep.mubr.msk.f32.mxu0 %vm322_vm0, %v315_v27  ;;  %684 = vmatmul.mubr.msk.f32.vlgmr.msra.gmra.mrb[0].mxu1 %vm322_vm0, %v318_v30  ;;  %v458_v27 = vld [vmem:[%s818_s10] sm:$0x1]  ;;  %v484_v30 = vld [vmem:[%s818_s10 + $0x1] sm:$0x1] }
  0x1b   : > { %686 = vmatprep.mubr.msk.f32.mxu1 %vm322_vm0, %v319_v32 }
  0x1d   : > { %681 = vmatmul.mubr.msk.f32.gmra.mrb[2].mxu0 %vm322_vm0, %v316_v33 }
  0x1e   : > { %687 = vmatmul.mubr.msk.f32.gmra.mrb[2].mxu1 %vm322_vm0, %v320_v34 }
  0xec   : > { %v679_v36 = vpop.f32.mrb[0].mxu0 }
  0xed   : > { %v461_v37 = vsel %vm459_vm2, %v679_v36, 0.0  ;;  %v486_v38 = vmul.f32 %v679_v36, %v679_v36  ;;  %517 = vst.msk [vmem:[%s269_s13 + $0x8] sm:$0xff] %vm459_vm2, %v679_v36  ;;  %v413_v39 = vpop.f32.mrb[1].mxu0  ;;  %v685_v40 = vpop.f32.mrb[0].mxu1 }
  0xee   : > { %v460_v41 = vsel %vm459_vm2, %v413_v39, 0.0  ;;  %v485_v42 = vmul.f32 %v413_v39, %v413_v39  ;;  %516 = vst.msk [vmem:[%s269_s13] sm:$0xff] %vm459_vm2, %v413_v39  ;;  %521 = vst.msk [vmem:[%s269_s13 + $0x28] sm:$0xff] %vm459_vm2, %v685_v40  ;;  %v433_v43 = vpop.f32.mrb[1].mxu1  ;;  %v490_v63 = vmul.f32 %v685_v40, %v685_v40  ;;  %v469_v4 = vsel %vm459_vm2, %v685_v40, 0.0 }
  0xef   : > { %v494_v44 = vsel %vm459_vm2, %v486_v38, 0.0  ;;  %v462_v45 = vadd.f32 %v461_v37, %v460_v41  ;;  %520 = vst.msk [vmem:[%s269_s13 + $0x20] sm:$0xff] %vm459_vm2, %v433_v43  ;;  %v489_v54 = vmul.f32 %v433_v43, %v433_v43  ;;  %v467_v59 = vsel %vm459_vm2, %v433_v43, 0.0 }
  0xf0   : > { %v493_v46 = vsel %vm459_vm2, %v485_v42, 0.0  ;;  %v682_v47 = vpop.f32.mrb[2].mxu0  ;;  %v502_v8 = vsel %vm459_vm2, %v490_v63, 0.0 }
  0xf1   : > { %v495_v48 = vadd.f32 %v494_v44, %v493_v46  ;;  %519 = vst.msk [vmem:[%s269_s13 + $0x18] sm:$0xff] %vm459_vm2, %v682_v47  ;;  %v423_v49 = vpop.f32.mrb[3].mxu0  ;;  %v688_v50 = vpop.f32.mrb[2].mxu1  ;;  %v488_v51 = vmul.f32 %v682_v47, %v682_v47  ;;  %v465_v57 = vsel %vm459_vm2, %v682_v47, 0.0  ;;  %v500_v0 = vsel %vm459_vm2, %v489_v54, 0.0 }
  0xf2   : > { %v463_v52 = vsel %vm459_vm2, %v423_v49, 0.0  ;;  %v487_v53 = vmul.f32 %v423_v49, %v423_v49  ;;  %518 = vst.msk [vmem:[%s269_s13 + $0x10] sm:$0xff] %vm459_vm2, %v423_v49  ;;  %523 = vst.msk [vmem:[%s269_s13 + $0x38] sm:$0xff] %vm459_vm2, %v688_v50  ;;  %v443_v55 = vpop.f32.mrb[3].mxu1  ;;  %v492_v9 = vmul.f32 %v688_v50, %v688_v50  ;;  %v473_v13 = vsel %vm459_vm2, %v688_v50, 0.0 }
  0xf3   : > { %v464_v56 = vadd.f32 %v463_v52, %v462_v45  ;;  %522 = vst.msk [vmem:[%s269_s13 + $0x30] sm:$0xff] %vm459_vm2, %v443_v55  ;;  %v498_v62 = vsel %vm459_vm2, %v488_v51, 0.0  ;;  %v491_v1 = vmul.f32 %v443_v55, %v443_v55  ;;  %v471_v5 = vsel %vm459_vm2, %v443_v55, 0.0 }
  0xf4   : > { %v496_v58 = vsel %vm459_vm2, %v487_v53, 0.0  ;;  %v506_v16 = vsel %vm459_vm2, %v492_v9, 0.0 }
  0xf5   : > { %v466_v60 = vadd.f32 %v465_v57, %v464_v56  ;;  %v497_v61 = vadd.f32 %v496_v58, %v495_v48  ;;  %v504_v10 = vsel %vm459_vm2, %v491_v1, 0.0 }
  0xf7   : > { %v499_v2 = vadd.f32 %v498_v62, %v497_v61  ;;  %v468_v3 = vadd.f32 %v467_v59, %v466_v60 }
  0xf9   : > { %v501_v6 = vadd.f32 %v500_v0, %v499_v2  ;;  %v470_v7 = vadd.f32 %v469_v4, %v468_v3 }
  0xfb   : > { %v472_v11 = vadd.f32 %v471_v5, %v470_v7  ;;  %v503_v12 = vadd.f32 %v502_v8, %v501_v6 }
  0xfd   : > { %v474_v14 = vadd.f32 %v473_v13, %v472_v11  ;;  %v505_v15 = vadd.f32 %v504_v10, %v503_v12 }
  0xff   : > { %v475_v17 = vrot.slane %v474_v14, 4  ;;  %v507_v18 = vadd.f32 %v506_v16, %v505_v15 }
 0x101   : > { %v476_v19 = vadd.f32 %v475_v17, %v474_v14  ;;  %v508_v20 = vrot.slane %v507_v18, 4 }
 0x103   : > { %v477_v21 = vrot.slane %v476_v19, 2  ;;  %v509_v22 = vadd.f32 %v508_v20, %v507_v18 }
 0x105   : > { %v478_v23 = vadd.f32 %v477_v21, %v476_v19  ;;  %v510_v24 = vrot.slane %v509_v22, 2 }
 0x107   : > { %v479_v25 = vrot.slane %v478_v23, 1  ;;  %v511_v26 = vadd.f32 %v510_v24, %v509_v22 }
 0x109   : > { %v480_v28 = vadd.f32 %v479_v25, %v478_v23  ;;  %v512_v29 = vrot.slane %v511_v26, 1 }
 0x10b   : > { %v481_v31 = vadd.f32 %v480_v28, %v458_v27  ;;  %v513_v32 = vadd.f32 %v512_v29, %v511_v26 }
 0x10d   : > { %483 = vst.msk [vmem:[%s818_s10] sm:$0x1] %vm482_vm3, %v481_v31  ;;  %v514_v33 = vadd.f32 %v513_v32, %v484_v30 }
 0x10f   : > { %515 = vst.msk [vmem:[%s818_s10 + $0x1] sm:$0x1] %vm482_vm3, %v514_v33 }
 0x110 PF: > { %s16_s20 = sadd.s32 1, %s738_s20   ;;  %s869_s18 = smov %s734_s19 }
 0x111   : > { %p13_p5 = scmp.ge.s32.totalorder %s16_s20, 4   ;;  %s870_s19 = smov %s872_s21 }
 0x113   :  { %15 = sbr.rel (!%p13_p5) target bundleno = 2 (0x2), region = 82 }

// kernel: block_forward_pallas.7
= control target key start
LH: loop header
LB: loop body
LE: loop exit
PB: predicated region body
PF: predicated region fallthrough
CT: control target
= control target key end

     0   :  { %11 = vsyncpa [#allocation3], 0  ;;  %s933_s0 = inlined_call_operand.vmem [shape: f32[2,8,8,16], index: 0, kind: input, shape index: {}]   ;;  %s934_s1 = inlined_call_operand.vmem [shape: f32[2,8,8,16], index: 1, kind: input, shape index: {}]   ;;  %s935_s2 = inlined_call_operand.vmem [shape: f32[1,16], index: 2, kind: input, shape index: {}]   ;;  %s936_s3 = inlined_call_operand.vmem [shape: f32[1,16], index: 3, kind: input, shape index: {}]   ;;  %s937_s4 = inlined_call_operand.vmem [shape: f32[1,16], index: 4, kind: input, shape index: {}]   ;;  %s938_s5 = inlined_call_operand.vmem [shape: f32[1,16], index: 5, kind: input, shape index: {}]   ;;  %s939_s6 = inlined_call_operand.hbm [shape: f32[2,8,8,16], index: 6, kind: output, shape index: {}]  }
   0x1   :  { %13 = vsyncpa [#allocation3 + $0x1], 0  ;;  %s728_s21 = smov 0   ;;  %s730_s22 = smov 0  }
   0x2   :  { %s732_s23 = smov 0   ;;  %s734_s24 = smov 0  }
   0x3   :  { %s736_s25 = smov 0   ;;  %s738_s26 = smov 0  }
   0x4 LB: > { %s531_s27 = sadd.s32 4294967295, %s688_s26   ;;  %s532_s28 = sadd.s32 4294967294, %s688_s26   ;;  %s688_s26 = sphi %s738_s26, %s19_s26   ;;  %s684_s25 = sphi %s736_s25, %s946_s25   ;;  %s680_s24 = sphi %s734_s24, %s945_s24   ;;  %s676_s23 = sphi %s732_s23, %s944_s23   ;;  %s672_s22 = sphi %s730_s22, %s943_s22   ;;  %s668_s21 = sphi %s728_s21, %s942_s21  }
   0x5   : > { %s31_s29 = sadd.s32 1, %s684_s25  ;;  %s180_s30 = sadd.s32 1, %s676_s23 }
   0x6   : > { %p33_p0 = scmp.ge.s32.totalorder %s31_s29, 2  ;;  %p190_p1 = scmp.ne.s32.totalorder %s676_s23, %s672_s22 }
   0x7   : > { %p191_p2 = scmp.eq.s32.totalorder %s531_s27, 1  ;;  %p196_p3 = scmp.ne.s32.totalorder %s672_s22, %s668_s21 }
   0x8   : > { %s948_s29 = smov (%p33_p0, %s31_s29), 0  ;;  %p197_p5 = scmp.eq.s32.totalorder %s532_s28, 1 }
   0x9   : > { %p768_p4 = por %p191_p2, %p190_p1  ;;  %s175_s8 = ssub.s32 %s684_s25, %s948_s29 }
   0xa   : > { %p535_p6 = scmp.ge.s32.totalorder %s688_s26, 1  ;;  %p178_p7 = scmp.eq.s32.totalorder %s175_s8, 0 }
   0xb   : > { %p775_p8 = por %p197_p5, %p196_p3  ;;  %p253_p9 = scmp.lt.s32.totalorder %s688_s26, 3 }
   0xc   : > { %s781_s10 = scalar_select %p178_p7, %s676_s23, %s180_s30  }
   0xd   : > { %p254_p10 = pnand %p535_p6, %p253_p9 }
   0xe   : > { %p297_p11 = scmp.lt.s32.totalorder (!%p254_p10), %s680_s24, 1  ;;  %v788_v0 = vld [vmem:[%s935_s2] ss:$0 sm:$0xff] (!%p254_p10)  ;;  %s293_s14 = sand.u32 (!%p254_p10), 1, %s672_s22   ;;  %vm409_vm0 = vcmask (!%p254_p10), 130048  }
   0xf   : > { %257 = sbr.rel (%p254_p10) target bundleno = 59 (0x3b), region = 44  ;;  %v793_v1 = vld [vmem:[%s937_s4] ss:$0 sm:$0xff] (!%p254_p10)  ;;  %s552_s17 = sshll.u32 (!%p254_p10), %s680_s24, 10 }
  0x10   : > { %v808_v2 = vld [vmem:[%s936_s3] ss:$0 sm:$0xff] (!%p254_p10)  ;;  %s881_s20 = scalar_lea.hbm (!%p254_p10), %s939_s6, %s552_s17 }
  0x11   : > { %v813_v3 = vld [vmem:[%s938_s5] ss:$0 sm:$0xff] (!%p254_p10) }
  0x16   : > { %s298_s11 = scalar_select %p297_p11, %s680_s24, 1 }
  0x17   : > { %s887_s24 = scalar_lea.sflag [#allocation3], %s293_s14 }
  0x18   : > { %s550_s12 = sshll.u32 %s298_s11, 6 }
  0x19   : > { %s798_s19 = scalar_lea.vmem %s933_s0, %s550_s12  ;;  %s803_s28 = scalar_lea.vmem %s934_s1, %s550_s12 }
  0x1a   : > { %v317_v4 = vld [vmem:[%s798_s19] sm:$0xff]  ;;  %v318_v6 = vld [vmem:[%s798_s19 + $0x8] sm:$0xff]  ;;  %v319_v11 = vld [vmem:[%s798_s19 + $0x10] sm:$0xff]  ;;  %s833_s12 = sshll.u32 %s293_s14, 6 }
  0x1b   : > { %v355_v5 = vld [vmem:[%s803_s28] sm:$0xff]  ;;  %v332_v7 = vmul.f32 %v788_v0, %v317_v4  ;;  %v333_v9 = vmul.f32 %v788_v0, %v318_v6  ;;  %v356_v10 = vld [vmem:[%s803_s28 + $0x8] sm:$0xff]  ;;  %v357_v12 = vld [vmem:[%s803_s28 + $0x10] sm:$0xff]  ;;  %v334_v14 = vmul.f32 %v788_v0, %v319_v11  ;;  %s295_s15 = scalar_lea.vmem [#allocation2], %s833_s12 }
  0x1c   : > { %v370_v8 = vmul.f32 %v793_v1, %v355_v5  ;;  %v371_v13 = vmul.f32 %v793_v1, %v356_v10  ;;  %v372_v15 = vmul.f32 %v793_v1, %v357_v12  ;;  %v320_v16 = vld [vmem:[%s798_s19 + $0x18] sm:$0xff]  ;;  %v321_v18 = vld [vmem:[%s798_s19 + $0x20] sm:$0xff]  ;;  %v322_v24 = vld [vmem:[%s798_s19 + $0x28] sm:$0xff]  ;;  %s434_s16 = sshll.u32 %s295_s15, 4  ;;  %s875_s16 = int_to_ptr.vmem [resolvable:$true] %s434_s16 }
  0x1d   : > { %v358_v17 = vld [vmem:[%s803_s28 + $0x18] sm:$0xff]  ;;  %v347_v19 = vadd.f32 %v808_v2, %v332_v7  ;;  %v348_v21 = vadd.f32 %v808_v2, %v333_v9  ;;  %v335_v22 = vmul.f32 %v788_v0, %v320_v16  ;;  %v359_v23 = vld [vmem:[%s803_s28 + $0x20] sm:$0xff]  ;;  %v349_v26 = vadd.f32 %v808_v2, %v334_v14  ;;  %v360_v29 = vld [vmem:[%s803_s28 + $0x28] sm:$0xff]  ;;  %s610_s27 = scalar_lea.vmem %s875_s16, 1024 }
  0x1e   : > { %v385_v20 = vadd.f32 %v813_v3, %v370_v8  ;;  %v386_v25 = vadd.f32 %v813_v3, %v371_v13  ;;  %v387_v27 = vadd.f32 %v813_v3, %v372_v15  ;;  %v373_v28 = vmul.f32 %v793_v1, %v358_v17  ;;  %v323_v38 = vld [vmem:[%s798_s19 + $0x30] sm:$0xff]  ;;  %v324_v44 = vld [vmem:[%s798_s19 + $0x38] sm:$0xff]  ;;  %p611_p12 = scmp.ne.s32.totalorder %s875_s16, %s610_s27 }
  0x1f   : > { %v350_v31 = vadd.f32 %v808_v2, %v335_v22  ;;  %v336_v32 = vmul.f32 %v788_v0, %v321_v18  ;;  %v374_v33 = vmul.f32 %v793_v1, %v359_v23  ;;  %v337_v37 = vmul.f32 %v788_v0, %v322_v24  ;;  %v361_v39 = vld [vmem:[%s803_s28 + $0x30] sm:$0xff]  ;;  %v362_v45 = vld [vmem:[%s803_s28 + $0x38] sm:$0xff]  ;;  %s690_s28 = smov [#allocation2]  }
  0x20   : > { %v393_v30 = vadd.f32 %v385_v20, %v347_v19  ;;  %v394_v34 = vadd.f32 %v386_v25, %v348_v21  ;;  %v395_v35 = vadd.f32 %v387_v27, %v349_v26  ;;  %v388_v36 = vadd.f32 %v813_v3, %v373_v28  ;;  %p612_p13 = pnand %p611_p12, %p768_p4  ;;  %s614_s30 = sshll.u32 %s690_s28, 4  ;;  %s615_s30 = int_to_ptr.vmem [resolvable:$false] %s614_s30 }
  0x21   : > { %v351_v41 = vadd.f32 %v808_v2, %v336_v32  ;;  %v389_v42 = vadd.f32 %v813_v3, %v374_v33  ;;  %v375_v43 = vmul.f32 %v793_v1, %v360_v29  ;;  %v352_v49 = vadd.f32 %v808_v2, %v337_v37  ;;  %s616_s8 = scalar_lea.vmem %s615_s30, 2048  ;;  %p617_p1 = scmp.lt.s32.totalorder %s875_s16, %s615_s30 }
  0x22   : > { %v401_v40 = vmax.f32 %v393_v30, 0.0  ;;  %v402_v46 = vmax.f32 %v394_v34, 0.0  ;;  %v403_v47 = vmax.f32 %v395_v35, 0.0  ;;  %v396_v48 = vadd.f32 %v388_v36, %v350_v31  ;;  %p613_p0 = pneg %p612_p13  ;;  %p618_p2 = scmp.lt.s32.totalorder %s616_s8, %s610_s27 }
  0x23   : > { %v397_v50 = vadd.f32 %v389_v42, %v351_v41  ;;  %v390_v51 = vadd.f32 %v813_v3, %v375_v43  ;;  %v338_v52 = vmul.f32 %v788_v0, %v323_v38  ;;  %v376_v53 = vmul.f32 %v793_v1, %v361_v39 }
  0x24   : > { %410 = vst.msk [vmem:[%s295_s15] sm:$0xff] %vm409_vm0, %v401_v40  ;;  %411 = vst.msk [vmem:[%s295_s15 + $0x8] sm:$0xff] %vm409_vm0, %v402_v46  ;;  %v404_v54 = vmax.f32 %v396_v48, 0.0  ;;  %v339_v55 = vmul.f32 %v788_v0, %v324_v44  ;;  %v377_v56 = vmul.f32 %v793_v1, %v362_v45  ;;  %p619_p3 = por %p618_p2, %p617_p1 }
  0x25   : > { %412 = vst.msk [vmem:[%s295_s15 + $0x10] sm:$0xff] %vm409_vm0, %v403_v47  ;;  %v405_v57 = vmax.f32 %v397_v50, 0.0  ;;  %v398_v58 = vadd.f32 %v390_v51, %v352_v49  ;;  %v353_v59 = vadd.f32 %v808_v2, %v338_v52  ;;  %v391_v60 = vadd.f32 %v813_v3, %v376_v53 }
  0x26   : > { %413 = vst.msk [vmem:[%s295_s15 + $0x18] sm:$0xff] %vm409_vm0, %v404_v54  ;;  %v354_v61 = vadd.f32 %v808_v2, %v339_v55  ;;  %v392_v62 = vadd.f32 %v813_v3, %v377_v56  ;;  %p620_p5 = pnand %p619_p3, %p613_p0 }
  0x27   : > { %414 = vst.msk [vmem:[%s295_s15 + $0x20] sm:$0xff] %vm409_vm0, %v405_v57  ;;  %v406_v63 = vmax.f32 %v398_v58, 0.0  ;;  %v399_v0 = vadd.f32 %v391_v60, %v353_v59 }
  0x28   : > { %v400_v1 = vadd.f32 %v392_v62, %v354_v61 }
  0x29   : > { %415 = vst.msk [vmem:[%s295_s15 + $0x28] sm:$0xff] %vm409_vm0, %v406_v63  ;;  %v407_v4 = vmax.f32 %v399_v0, 0.0 }
  0x2a   : > { %v408_v2 = vmax.f32 %v400_v1, 0.0 }
  0x2b   : > { %416 = vst.msk [vmem:[%s295_s15 + $0x30] sm:$0xff] %vm409_vm0, %v407_v4 }
  0x2c   : > { %417 = vst.msk [vmem:[%s295_s15 + $0x38] sm:$0xff] %vm409_vm0, %v408_v2 }
  0x2d   : > { %623 = shalt.err (!%p620_p5)
}
  0x2e   : > { %s624_s11 = scalar_lea.hbm %s881_s20, 1024  ;;  %s628_s12 = scalar_lea.hbm %s939_s6, 2048 }
  0x2f   : > { %p625_p6 = scmp.ne.s32.totalorder %s881_s20, %s624_s11  ;;  %p629_p10 = scmp.lt.u32.totalorder %s881_s20, %s939_s6 }
  0x30   : > { %p630_p11 = scmp.lt.u32.totalorder %s628_s12, %s624_s11  ;;  %p632_p13 = scmp.lt.u32.totalorder %s624_s11, %s881_s20 }
  0x31   : > { %p626_p7 = pnand %p625_p6, %p768_p4 }
  0x32   : > { %p631_p12 = por %p630_p11, %p629_p10 }
  0x33   : > { %p627_p9 = pneg %p626_p7 }
  0x34   : > { %p633_p0 = por %p632_p13, %p631_p12 }
  0x36   : > { %p634_p1 = pnand %p633_p0, %p627_p9 }
  0x38   : > { %637 = shalt.err (!%p634_p1)
}
  0x39   : > { %s691_s18 = smov 128   ;;  %s692_s19 = smov 8  }
  0x3a   : > { %553 = dma.vmem_to_hbm [thread:$0]  (%p768_p4), %s875_s16, 1024, %s881_s20, %s887_s24, %s691_s18, %s691_s18, %s692_s19  }
  0x3b PF: > { %p559_p2 = scmp.ge.s32.totalorder %s688_s26, 2  ;;  %s449_s27 = sand.u32 1, %s668_s21  }
  0x3c   : > { %s450_s28 = scalar_lea.sflag [#allocation3], %s449_s27 }
  0x3d   : > { %p556_p3 = pnand %p559_p2, %p775_p8 }
  0x3f   : > { %663 = dma.done.wait (!%p556_p3), %s450_s28, 1024  }
  0x40   : > { %665 = vsyncadd (!%p556_p3), %s450_s28, 4294966272  ;;  %s19_s26 = sadd.s32 1, %s688_s26   ;;  %s942_s21 = smov %s672_s22 }
  0x41   : > { %p16_p5 = scmp.ge.s32.totalorder %s19_s26, 4   ;;  %s943_s22 = smov %s676_s23 }
  0x42   : > { %s944_s23 = smov %s781_s10  ;;  %s945_s24 = smov %s684_s25 }
  0x43   : > { %s946_s25 = smov %s948_s29  ;;  %18 = sbr.rel (!%p16_p5) target bundleno = 4 (0x4), region = 82 }
  0x4a   :  { %455 = vsyncpa [#allocation3], 1 }
  0x4b   :  { %457 = vsyncpa [#allocation3 + $0x1], 1 }

// kernel: block_forward_pallas.5
= control target key start
LH: loop header
LB: loop body
LE: loop exit
PB: predicated region body
PF: predicated region fallthrough
CT: control target
= control target key end

     0   :  { %s1944_s18 = smov 0   ;;  %s2235_s0 = inlined_call_operand.vmem [shape: f32[2,8,8,8], index: 0, kind: input, shape index: {}]   ;;  %s2236_s1 = inlined_call_operand.vmem [shape: f32[1,8], index: 1, kind: input, shape index: {}]   ;;  %s2237_s2 = inlined_call_operand.vmem [shape: f32[1,8], index: 2, kind: input, shape index: {}]   ;;  %s2238_s3 = inlined_call_operand.vmem [shape: f32[3,3,8,8], index: 3, kind: input, shape index: {}]   ;;  %s2239_s4 = inlined_call_operand.vmem [shape: f32[2,8,8,8], index: 4, kind: output, shape index: {0}]   ;;  %s2240_s5 = inlined_call_operand.vmem [shape: f32[2,2,8], index: 5, kind: output, shape index: {1}]  }
   0x1 LB: > { %s1546_s19 = sadd.s32 4294967295, %s1912_s18   ;;  %p1550_p0 = scmp.ge.s32.totalorder %s1912_s18, 1  ;;  %s1912_s18 = sphi %s1944_s18, %s16_s18  }
   0x2   : > { %p190_p1 = scmp.lt.s32.totalorder %s1912_s18, 3 }
   0x4   : > { %p191_p2 = pnand %p1550_p0, %p190_p1 }
   0x5   : > { %v1558_v0 = vld [vmem:[%s2238_s3 + $0x8] sm:$0xff] (!%p191_p2)  ;;  %p222_p3 = scmp.lt.s32.totalorder (!%p191_p2), %s1546_s19, 1  ;;  %v340_v1 = vld [vmem:[%s2238_s3] sm:$0xff] (!%p191_p2)  ;;  %v1575_v2 = vld [vmem:[%s2238_s3 + $0x10] sm:$0xff] (!%p191_p2)  ;;  %vm343_vm0 = vcmask (!%p191_p2), 64512   ;;  %vm306_vm1 = vcmask (!%p191_p2), 1040384  }
   0x6   : > { %194 = sbr.rel (%p191_p2) target bundleno = 332 (0x14c), region = 36  ;;  %1723 = vmatprep.subr.mxu1 (!%p191_p2), %v1558_v0  ;;  %1737 = vmatprep.subr.mxu0 (!%p191_p2), %v340_v1  ;;  %v1556_v3 = vld [vmem:[%s2236_s1] ss:$0 sm:$0xff] (!%p191_p2)  ;;  %vm331_vm2 = vcmask (!%p191_p2), 1046528   ;;  %v1612_v42 = vld [vmem:[%s2238_s3 + $0x38] sm:$0xff] (!%p191_p2)  ;;  %v1611_v59 = vld [vmem:[%s2238_s3 + $0x30] sm:$0xff] (!%p191_p2) }
   0x7   : > { %1724 = vmatpush3.msra.mxu1 (!%p191_p2), %v1558_v0  ;;  %1738 = vmatpush3.msra.mxu0 (!%p191_p2), %v340_v1  ;;  %v1557_v4 = vld [vmem:[%s2237_s2] ss:$0 sm:$0xff] (!%p191_p2)  ;;  %vm1420_vm3 = vcmask (!%p191_p2), 57344  }
   0x8   : > { %1849 = vmatprep.subr.mxu1 (!%p191_p2), %v340_v1  ;;  %1751 = vmatprep.subr.mxu0 (!%p191_p2), %v1575_v2  ;;  %v1991_v32 = vld [vmem:[%s2238_s3 + $0x20] sm:$0xff] (!%p191_p2) }
   0xd   : > { %s2242_s19 = smov (!%p222_p3, %s1546_s19), 1 }
   0xe   : > { %s1640_s26 = sshll.u32 %s2242_s19, 6 }
   0xf   : > { %s226_s6 = scalar_lea.vmem %s2235_s0, %s1640_s26  ;;  %s2194_s25 = scalar_lea.vmem %s2239_s4, %s1640_s26 }
  0x10   : > { %v238_v5 = vld [vmem:[%s226_s6] sm:$0xff]  ;;  %v239_v6 = vld [vmem:[%s226_s6 + $0x8] sm:$0xff]  ;;  %v240_v7 = vld [vmem:[%s226_s6 + $0x10] sm:$0xff]  ;;  %s1555_s26 = sshll.u32 %s2242_s19, 1 }
  0x11   : > { %v252_v8 = vmul.f32 %v1556_v3, %v238_v5  ;;  %v253_v9 = vmul.f32 %v1556_v3, %v239_v6  ;;  %v254_v10 = vmul.f32 %v1556_v3, %v240_v7  ;;  %v241_v11 = vld [vmem:[%s226_s6 + $0x18] sm:$0xff]  ;;  %v242_v12 = vld [vmem:[%s226_s6 + $0x20] sm:$0xff]  ;;  %v243_v13 = vld [vmem:[%s226_s6 + $0x28] sm:$0xff]  ;;  %s235_s29 = scalar_lea.vmem %s2240_s5, %s1555_s26 }
  0x12   : > { %v255_v14 = vmul.f32 %v1556_v3, %v241_v11  ;;  %v256_v15 = vmul.f32 %v1556_v3, %v242_v12  ;;  %v244_v16 = vld [vmem:[%s226_s6 + $0x30] sm:$0xff]  ;;  %v257_v21 = vmul.f32 %v1556_v3, %v243_v13  ;;  %v245_v27 = vld [vmem:[%s226_s6 + $0x38] sm:$0xff] }
  0x13   : > { %v266_v17 = vadd.f32 %v1557_v4, %v252_v8  ;;  %v267_v18 = vadd.f32 %v1557_v4, %v253_v9  ;;  %v268_v19 = vadd.f32 %v1557_v4, %v254_v10  ;;  %v258_v22 = vmul.f32 %v1556_v3, %v244_v16  ;;  %v1602_v9 = vld [vmem:[%s2238_s3 + $0x28] sm:$0xff]  ;;  %v1629_v10 = vld [vmem:[%s2238_s3 + $0x40] sm:$0xff] }
  0x14   : > { %v269_v20 = vadd.f32 %v1557_v4, %v255_v14  ;;  %v270_v26 = vadd.f32 %v1557_v4, %v256_v15  ;;  %v271_v34 = vadd.f32 %v1557_v4, %v257_v21  ;;  %v259_v36 = vmul.f32 %v1556_v3, %v245_v27  ;;  %v1584_v3 = vld [vmem:[%s2238_s3 + $0x18] sm:$0xff] }
  0x15   : > { %v1975_v23 = vmax.f32 %v266_v17, 0.0  ;;  %v1977_v24 = vmax.f32 %v267_v18, 0.0  ;;  %v1979_v25 = vmax.f32 %v268_v19, 0.0  ;;  %v272_v35 = vadd.f32 %v1557_v4, %v258_v22 }
  0x16   : > { %v1981_v28 = vmax.f32 %v269_v20, 0.0  ;;  %v2004_v39 = vmax.f32 %v270_v26, 0.0  ;;  %v2023_v44 = vmax.f32 %v271_v34, 0.0  ;;  %v273_v46 = vadd.f32 %v1557_v4, %v259_v36 }
  0x17   : > { %1725 = vmatprep.mubr.msk.f32.mxu1 %vm343_vm0, %v1975_v23  ;;  %v290_v29 = vrot.slane %v1975_v23, 7  ;;  %v291_v30 = vrot.slane %v1977_v24, 7  ;;  %v292_v31 = vrot.slane %v1979_v25, 7  ;;  %v315_v40 = vrot.slane %v1975_v23, 1 }
  0x18   : > { %1726 = vmatmul.mubr.msk.f32.vlgmr.msra.gmra.mrb[0].mxu1 %vm343_vm0, %v1977_v24  ;;  %v293_v33 = vrot.slane %v1981_v28, 7  ;;  %v316_v45 = vrot.slane %v1977_v24, 1  ;;  %v2033_v48 = vmax.f32 %v272_v35, 0.0  ;;  %v317_v49 = vrot.slane %v1979_v25, 1 }
  0x19   : > { %v1997_v37 = vsel %vm306_vm1, 0.0, %v290_v29  ;;  %1728 = vmatprep.mubr.msk.f32.mxu1 %vm343_vm0, %v1979_v25  ;;  %1850 = vmatpush3.msra.mxu1 %v340_v1  ;;  %v2002_v38 = vsel %vm306_vm1, 0.0, %v291_v30  ;;  %v2010_v41 = vsel %vm306_vm1, 0.0, %v292_v31  ;;  %v2031_v47 = vsel %vm331_vm2, %v315_v40, 0.0 }
  0x1a   : > { %1739 = vmatprep.mubr.msk.f32.mxu0 %vm343_vm0, %v1997_v37  ;;  %1765 = vmatprep.subr.mxu1 %v1991_v32  ;;  %v2021_v43 = vsel %vm306_vm1, 0.0, %v293_v33  ;;  %v294_v50 = vrot.slane %v2004_v39, 7  ;;  %v2044_v51 = vsel %vm331_vm2, %v316_v45, 0.0  ;;  %v281_v52 = vmax.f32 %v273_v46, 0.0 }
  0x1b   : > { %1740 = vmatmul.mubr.msk.f32.vlgmr.msra.gmra.mrb[0].mxu0 %vm343_vm0, %v2002_v38  ;;  %v318_v53 = vrot.slane %v1981_v28, 1  ;;  %v295_v54 = vrot.slane %v2023_v44, 7  ;;  %v319_v55 = vrot.slane %v2004_v39, 1  ;;  %v2052_v56 = vsel %vm331_vm2, %v317_v49, 0.0 }
  0x1c   : > { %1752 = vmatpush3.msra.mxu0 %v1575_v2  ;;  %1729 = vmatmul.mubr.msk.f32.gmra.mrb[2].mxu1 %vm343_vm0, %v1981_v28  ;;  %v2055_v57 = vsel %vm306_vm1, 0.0, %v294_v50  ;;  %v296_v58 = vrot.slane %v2033_v48, 7  ;;  %v320_v61 = vrot.slane %v2023_v44, 1  ;;  %v297_v0 = vrot.slane %v281_v52, 7 }
  0x1d   : > { %1742 = vmatprep.mubr.msk.f32.mxu0 %vm343_vm0, %v2010_v41  ;;  %1731 = vmatprep.mubr.msk.f32.mxu1 %vm343_vm0, %v2004_v39  ;;  %v2065_v60 = vsel %vm331_vm2, %v318_v53, 0.0  ;;  %v312_v62 = vsel %vm306_vm1, 0.0, %v295_v54  ;;  %v2074_v63 = vsel %vm331_vm2, %v319_v55, 0.0  ;;  %v321_v1 = vrot.slane %v2033_v48, 1 }
  0x1e   : > { %1807 = vmatprep.subr.mxu0 %v1612_v42  ;;  %v313_v2 = vsel %vm306_vm1, 0.0, %v296_v58  ;;  %v2087_v4 = vsel %vm331_vm2, %v320_v61, 0.0  ;;  %v322_v5 = vrot.slane %v281_v52, 1  ;;  %v314_v6 = vsel %vm306_vm1, 0.0, %v297_v0 }
  0x1f   : > { %1743 = vmatmul.mubr.msk.f32.gmra.mrb[2].mxu0 %vm343_vm0, %v2021_v43  ;;  %v338_v7 = vsel %vm331_vm2, %v321_v1, 0.0 }
  0x20   : > { %1732 = vmatmul.mubr.msk.f32.gmra.mrb[4].mxu1 %vm343_vm0, %v2023_v44  ;;  %1753 = vmatprep.mubr.msk.f32.mxu0 %vm343_vm0, %v2031_v47  ;;  %v339_v8 = vsel %vm331_vm2, %v322_v5, 0.0 }
  0x21   : > { %1734 = vmatprep.mubr.msk.f32.mxu1 %vm343_vm0, %v2033_v48 }
  0x23   : > { %1754 = vmatmul.mubr.msk.f32.vlgmr.msra.gmra.mrb[0].mxu0 %vm343_vm0, %v2044_v51 }
  0x24   : > { %1808 = vmatpush3.msra.mxu0 %v1612_v42  ;;  %1735 = vmatmul.mubr.msk.f32.gmra.mrb[6].mxu1 %vm343_vm0, %v281_v52 }
  0x25   : > { %1756 = vmatprep.mubr.msk.f32.mxu0 %vm343_vm0, %v2052_v56  ;;  %1745 = vmatprep.mubr.msk.f32.mxu1 %vm343_vm0, %v2055_v57 }
  0x26   : > { %1821 = vmatprep.subr.mxu0 %v1611_v59 }
  0x27   : > { %1757 = vmatmul.mubr.msk.f32.gmra.mrb[2].mxu0 %vm343_vm0, %v2065_v60 }
  0x28   : > { %1746 = vmatmul.mubr.msk.f32.vlgmr.msra.gmra.mrb[4].mxu1 %vm343_vm0, %v312_v62  ;;  %1759 = vmatprep.mubr.msk.f32.mxu0 %vm343_vm0, %v2074_v63 }
  0x29   : > { %1748 = vmatprep.mubr.msk.f32.mxu1 %vm343_vm0, %v313_v2  ;;  %1766 = vmatpush3.msra.mxu1 %v1991_v32 }
  0x2a   : > { %1779 = vmatprep.subr.mxu1 %v1584_v3 }
  0x2b   : > { %1760 = vmatmul.mubr.msk.f32.gmra.mrb[4].mxu0 %vm343_vm0, %v2087_v4 }
  0x2c   : > { %1749 = vmatmul.mubr.msk.f32.gmra.mrb[6].mxu1 %vm343_vm0, %v314_v6  ;;  %1762 = vmatprep.mubr.msk.f32.mxu0 %vm343_vm0, %v338_v7 }
  0x2d   : > { %1767 = vmatprep.mubr.msk.f32.mxu1 %vm343_vm0, %v1975_v23 }
  0x2f   : > { %1763 = vmatmul.mubr.msk.f32.gmra.mrb[6].mxu0 %vm343_vm0, %v339_v8 }
  0x30   : > { %1768 = vmatmul.mubr.msk.f32.vlgmr.msra.gmra.mrb[8].mxu1 %vm343_vm0, %v1977_v24  ;;  %1809 = vmatprep.mubr.msk.f32.mxu0 %vm343_vm0, %v1975_v23 }
  0x31   : > { %1770 = vmatprep.mubr.msk.f32.mxu1 %vm343_vm0, %v1979_v25  ;;  %1780 = vmatpush3.msra.mxu1 %v1584_v3 }
  0x32   : > { %1793 = vmatprep.subr.mxu1 %v1602_v9 }
  0x33   : > { %1810 = vmatmul.mubr.msk.f32.vlgmr.msra.gmra.mrb[8].mxu0 %vm343_vm0, %v1977_v24 }
  0x34   : > { %1822 = vmatpush3.msra.mxu0 %v1611_v59  ;;  %1771 = vmatmul.mubr.msk.f32.gmra.mrb[10].mxu1 %vm343_vm0, %v1981_v28 }
  0x35   : > { %1812 = vmatprep.mubr.msk.f32.mxu0 %vm343_vm0, %v1979_v25  ;;  %1773 = vmatprep.mubr.msk.f32.mxu1 %vm343_vm0, %v2004_v39 }
  0x36   : > { %1835 = vmatprep.subr.mxu0 %v1629_v10 }
  0x37   : > { %1813 = vmatmul.mubr.msk.f32.gmra.mrb[10].mxu0 %vm343_vm0, %v1981_v28 }
  0x38   : > { %1774 = vmatmul.mubr.msk.f32.gmra.mrb[12].mxu1 %vm343_vm0, %v2023_v44  ;;  %1815 = vmatprep.mubr.msk.f32.mxu0 %vm343_vm0, %v2004_v39 }
  0x39   : > { %1776 = vmatprep.mubr.msk.f32.mxu1 %vm343_vm0, %v2033_v48 }
  0x3b   : > { %1816 = vmatmul.mubr.msk.f32.gmra.mrb[12].mxu0 %vm343_vm0, %v2023_v44 }
  0x3c   : > { %1777 = vmatmul.mubr.msk.f32.gmra.mrb[14].mxu1 %vm343_vm0, %v281_v52  ;;  %1818 = vmatprep.mubr.msk.f32.mxu0 %vm343_vm0, %v2033_v48 }
  0x3d   : > { %1781 = vmatprep.mubr.msk.f32.mxu1 %vm343_vm0, %v1997_v37 }
  0x3f   : > { %1819 = vmatmul.mubr.msk.f32.gmra.mrb[14].mxu0 %vm343_vm0, %v281_v52 }
  0x40   : > { %1782 = vmatmul.mubr.msk.f32.vlgmr.msra.gmra.mrb[8].mxu1 %vm343_vm0, %v2002_v38  ;;  %1823 = vmatprep.mubr.msk.f32.mxu0 %vm343_vm0, %v1997_v37 }
  0x41   : > { %1784 = vmatprep.mubr.msk.f32.mxu1 %vm343_vm0, %v2010_v41  ;;  %1794 = vmatpush3.msra.mxu1 %v1602_v9 }
  0x43   : > { %1824 = vmatmul.mubr.msk.f32.vlgmr.msra.gmra.mrb[8].mxu0 %vm343_vm0, %v2002_v38 }
  0x44   : > { %1836 = vmatpush3.msra.mxu0 %v1629_v10  ;;  %1785 = vmatmul.mubr.msk.f32.gmra.mrb[10].mxu1 %vm343_vm0, %v2021_v43 }
  0x45   : > { %1826 = vmatprep.mubr.msk.f32.mxu0 %vm343_vm0, %v2010_v41  ;;  %1787 = vmatprep.mubr.msk.f32.mxu1 %vm343_vm0, %v2055_v57 }
  0x47   : > { %1827 = vmatmul.mubr.msk.f32.gmra.mrb[10].mxu0 %vm343_vm0, %v2021_v43 }
  0x48   : > { %1788 = vmatmul.mubr.msk.f32.gmra.mrb[12].mxu1 %vm343_vm0, %v312_v62  ;;  %1829 = vmatprep.mubr.msk.f32.mxu0 %vm343_vm0, %v2055_v57 }
  0x49   : > { %1790 = vmatprep.mubr.msk.f32.mxu1 %vm343_vm0, %v313_v2 }
  0x4b   : > { %1830 = vmatmul.mubr.msk.f32.gmra.mrb[12].mxu0 %vm343_vm0, %v312_v62 }
  0x4c   : > { %1791 = vmatmul.mubr.msk.f32.gmra.mrb[14].mxu1 %vm343_vm0, %v314_v6  ;;  %1832 = vmatprep.mubr.msk.f32.mxu0 %vm343_vm0, %v313_v2 }
  0x4d   : > { %1795 = vmatprep.mubr.msk.f32.mxu1 %vm343_vm0, %v2031_v47 }
  0x4f   : > { %1833 = vmatmul.mubr.msk.f32.gmra.mrb[14].mxu0 %vm343_vm0, %v314_v6 }
  0x50   : > { %1796 = vmatmul.mubr.msk.f32.vlgmr.msra.gmra.mrb[8].mxu1 %vm343_vm0, %v2044_v51  ;;  %1837 = vmatprep.mubr.msk.f32.mxu0 %vm343_vm0, %v2031_v47 }
  0x51   : > { %1798 = vmatprep.mubr.msk.f32.mxu1 %vm343_vm0, %v2052_v56 }
  0x53   : > { %1838 = vmatmul.mubr.msk.f32.vlgmr.msra.gmra.mrb[8].mxu0 %vm343_vm0, %v2044_v51 }
  0x54   : > { %1799 = vmatmul.mubr.msk.f32.gmra.mrb[10].mxu1 %vm343_vm0, %v2065_v60  ;;  %1840 = vmatprep.mubr.msk.f32.mxu0 %vm343_vm0, %v2052_v56 }
  0x55   : > { %1801 = vmatprep.mubr.msk.f32.mxu1 %vm343_vm0, %v2074_v63 }
  0x57   : > { %1841 = vmatmul.mubr.msk.f32.gmra.mrb[10].mxu0 %vm343_vm0, %v2065_v60 }
  0x58   : > { %1802 = vmatmul.mubr.msk.f32.gmra.mrb[12].mxu1 %vm343_vm0, %v2087_v4  ;;  %1843 = vmatprep.mubr.msk.f32.mxu0 %vm343_vm0, %v2074_v63 }
  0x59   : > { %1804 = vmatprep.mubr.msk.f32.mxu1 %vm343_vm0, %v338_v7 }
  0x5b   : > { %1844 = vmatmul.mubr.msk.f32.gmra.mrb[12].mxu0 %vm343_vm0, %v2087_v4 }
  0x5c   : > { %1805 = vmatmul.mubr.msk.f32.gmra.mrb[14].mxu1 %vm343_vm0, %v339_v8  ;;  %1846 = vmatprep.mubr.msk.f32.mxu0 %vm343_vm0, %v338_v7 }
  0x5f   : > { %1847 = vmatmul.mubr.msk.f32.gmra.mrb[14].mxu0 %vm343_vm0, %v339_v8 }
  0xeb   : > { %v1727_v11 = vpop.f32.mrb[0].mxu1 }
  0xec   : > { %v426_v12 = vpop.f32.mrb[1].mxu1 }
  0xef   : > { %v1730_v13 = vpop.f32.mrb[2].mxu1 }
  0xf0   : > { %v436_v14 = vpop.f32.mrb[3].mxu1 }
  0xf6   : > { %v1755_v15 = vpop.f32.mrb[0].mxu0 }
  0xf7   : > { %v1851_v16 = vadd.f32 %v1755_v15, %v1727_v11  ;;  %v684_v17 = vpop.f32.mrb[1].mxu0 }
  0xf8   : > { %v1852_v18 = vadd.f32 %v684_v17, %v426_v12 }
  0xfa   : > { %v1758_v19 = vpop.f32.mrb[2].mxu0 }
  0xfb   : > { %v1853_v20 = vadd.f32 %v1758_v19, %v1730_v13  ;;  %v1747_v21 = vpop.f32.mrb[4].mxu1  ;;  %v694_v22 = vpop.f32.mrb[3].mxu0 }
  0xfc   : > { %v1854_v23 = vadd.f32 %v694_v22, %v436_v14  ;;  %v574_v24 = vpop.f32.mrb[5].mxu1 }
  0xfe   : > { %v1761_v25 = vpop.f32.mrb[4].mxu0 }
  0xff   : > { %v1855_v26 = vadd.f32 %v1761_v25, %v1747_v21  ;;  %v1750_v27 = vpop.f32.mrb[6].mxu1  ;;  %v704_v28 = vpop.f32.mrb[5].mxu0 }
 0x100   : > { %v1856_v29 = vadd.f32 %v704_v28, %v574_v24  ;;  %v584_v30 = vpop.f32.mrb[7].mxu1 }
 0x102   : > { %v1764_v31 = vpop.f32.mrb[6].mxu0 }
 0x103   : > { %v714_v32 = vpop.f32.mrb[7].mxu0 }
 0x104   : > { %v1857_v33 = vadd.f32 %v714_v32, %v584_v30 }
 0x123   : > { %v1797_v34 = vpop.f32.mrb[8].mxu1 }
 0x124   : > { %v1384_v35 = vadd.f32 %v1852_v18, %v1797_v34  ;;  %v1011_v36 = vpop.f32.mrb[9].mxu1 }
 0x126   : > { %v1839_v37 = vpop.f32.mrb[8].mxu0 }
 0x127   : > { %v1391_v38 = vadd.f32 %v1839_v37, %v1011_v36  ;;  %v1800_v39 = vpop.f32.mrb[10].mxu1  ;;  %v1338_v40 = vpop.f32.mrb[9].mxu0 }
 0x128   : > { %v1386_v41 = vadd.f32 %v1854_v23, %v1800_v39  ;;  %v1021_v42 = vpop.f32.mrb[11].mxu1 }
 0x129   : > { %1452 = vst.msk [vmem:[%s2194_s25] sm:$0xff] %vm343_vm0, %v1391_v38  ;;  %v1385_v43 = vadd.f32 %v1851_v16, %v1021_v42  ;;  %v1422_v45 = vmul.f32 %v1391_v38, %v1391_v38  ;;  %v1399_v53 = vsel %vm343_vm0, %v1391_v38, 0.0 }
 0x12a   : > { %v1842_v44 = vpop.f32.mrb[10].mxu0 }
 0x12b   : > { %v1393_v46 = vadd.f32 %v1842_v44, %v1385_v43  ;;  %v1803_v47 = vpop.f32.mrb[12].mxu1  ;;  %v1347_v48 = vpop.f32.mrb[11].mxu0  ;;  %v1430_v58 = vsel %vm343_vm0, %v1422_v45, 0.0 }
 0x12c   : > { %v1388_v49 = vadd.f32 %v1856_v29, %v1803_v47  ;;  %v1392_v50 = vadd.f32 %v1384_v35, %v1347_v48  ;;  %v1031_v51 = vpop.f32.mrb[13].mxu1 }
 0x12d   : > { %1454 = vst.msk [vmem:[%s2194_s25 + $0x10] sm:$0xff] %vm343_vm0, %v1393_v46  ;;  %v1387_v52 = vadd.f32 %v1853_v20, %v1031_v51  ;;  %v1424_v54 = vmul.f32 %v1393_v46, %v1393_v46  ;;  %v1402_v63 = vsel %vm343_vm0, %v1393_v46, 0.0 }
 0x12e   : > { %v1400_v55 = vsel %vm343_vm0, %v1392_v50, 0.0  ;;  %v1423_v56 = vmul.f32 %v1392_v50, %v1392_v50  ;;  %1453 = vst.msk [vmem:[%s2194_s25 + $0x8] sm:$0xff] %vm343_vm0, %v1392_v50  ;;  %v1845_v57 = vpop.f32.mrb[12].mxu0 }
 0x12f   : > { %v1401_v59 = vadd.f32 %v1400_v55, %v1399_v53  ;;  %v1395_v60 = vadd.f32 %v1845_v57, %v1387_v52  ;;  %v1806_v61 = vpop.f32.mrb[14].mxu1  ;;  %v1357_v62 = vpop.f32.mrb[13].mxu0  ;;  %v1433_v6 = vsel %vm343_vm0, %v1424_v54, 0.0 }
 0x130   : > { %v1431_v0 = vsel %vm343_vm0, %v1423_v56, 0.0  ;;  %v1390_v1 = vadd.f32 %v1857_v33, %v1806_v61  ;;  %v1394_v2 = vadd.f32 %v1386_v41, %v1357_v62  ;;  %v1041_v3 = vpop.f32.mrb[15].mxu1 }
 0x131   : > { %v1432_v4 = vadd.f32 %v1431_v0, %v1430_v58  ;;  %1456 = vst.msk [vmem:[%s2194_s25 + $0x20] sm:$0xff] %vm343_vm0, %v1395_v60  ;;  %v1403_v5 = vadd.f32 %v1402_v63, %v1401_v59  ;;  %v1426_v7 = vmul.f32 %v1395_v60, %v1395_v60  ;;  %v1389_v13 = vadd.f32 %v1855_v26, %v1041_v3 }
 0x132   : > { %1459 = vst.msk [vmem:[%s2194_s25 + $0x38] sm:$0xff] %vm343_vm0, %v1390_v1  ;;  %v1404_v8 = vsel %vm343_vm0, %v1394_v2, 0.0  ;;  %v1425_v9 = vmul.f32 %v1394_v2, %v1394_v2  ;;  %1455 = vst.msk [vmem:[%s2194_s25 + $0x18] sm:$0xff] %vm343_vm0, %v1394_v2  ;;  %v1848_v10 = vpop.f32.mrb[14].mxu0  ;;  %v1406_v15 = vsel %vm343_vm0, %v1395_v60, 0.0  ;;  %v1429_v27 = vmul.f32 %v1390_v1, %v1390_v1 }
 0x133   : > { %v1405_v11 = vadd.f32 %v1404_v8, %v1403_v5  ;;  %v1434_v12 = vadd.f32 %v1433_v6, %v1432_v4  ;;  %v1367_v14 = vpop.f32.mrb[15].mxu0  ;;  %v1397_v19 = vadd.f32 %v1848_v10, %v1389_v13  ;;  %v1437_v21 = vsel %vm343_vm0, %v1426_v7, 0.0 }
 0x134   : > { %v1435_v16 = vsel %vm343_vm0, %v1425_v9, 0.0  ;;  %v1396_v17 = vadd.f32 %v1388_v49, %v1367_v14  ;;  %v1412_v32 = vsel %vm343_vm0, %v1390_v1, 0.0  ;;  %v1443_v36 = vsel %vm343_vm0, %v1429_v27, 0.0 }
 0x135   : > { %v1436_v18 = vadd.f32 %v1435_v16, %v1434_v12  ;;  %v1407_v20 = vadd.f32 %v1406_v15, %v1405_v11  ;;  %v1428_v24 = vmul.f32 %v1397_v19, %v1397_v19  ;;  %1458 = vst.msk [vmem:[%s2194_s25 + $0x30] sm:$0xff] %vm343_vm0, %v1397_v19  ;;  %v1410_v28 = vsel %vm343_vm0, %v1397_v19, 0.0 }
 0x136   : > { %v1408_v22 = vsel %vm343_vm0, %v1396_v17, 0.0  ;;  %v1427_v23 = vmul.f32 %v1396_v17, %v1396_v17  ;;  %1457 = vst.msk [vmem:[%s2194_s25 + $0x28] sm:$0xff] %vm343_vm0, %v1396_v17 }
 0x137   : > { %v1409_v25 = vadd.f32 %v1408_v22, %v1407_v20  ;;  %v1438_v26 = vadd.f32 %v1437_v21, %v1436_v18  ;;  %v1441_v33 = vsel %vm343_vm0, %v1428_v24, 0.0 }
 0x138   : > { %v1439_v29 = vsel %vm343_vm0, %v1427_v23, 0.0 }
 0x139   : > { %v1411_v30 = vadd.f32 %v1410_v28, %v1409_v25  ;;  %v1440_v31 = vadd.f32 %v1439_v29, %v1438_v26 }
 0x13b   : > { %v1413_v34 = vadd.f32 %v1412_v32, %v1411_v30  ;;  %v1442_v35 = vadd.f32 %v1441_v33, %v1440_v31 }
 0x13d   : > { %v1414_v37 = vrot.slane %v1413_v34, 4  ;;  %v1444_v38 = vadd.f32 %v1443_v36, %v1442_v35 }
 0x13f   : > { %v1415_v39 = vadd.f32 %v1414_v37, %v1413_v34  ;;  %v1445_v40 = vrot.slane %v1444_v38, 4 }
 0x141   : > { %v1416_v41 = vrot.slane %v1415_v39, 2  ;;  %v1446_v42 = vadd.f32 %v1445_v40, %v1444_v38 }
 0x143   : > { %v1417_v43 = vadd.f32 %v1416_v41, %v1415_v39  ;;  %v1447_v44 = vrot.slane %v1446_v42, 2 }
 0x145   : > { %v1418_v45 = vrot.slane %v1417_v43, 1  ;;  %v1448_v46 = vadd.f32 %v1447_v44, %v1446_v42 }
 0x147   : > { %v1419_v47 = vadd.f32 %v1418_v45, %v1417_v43  ;;  %v1449_v48 = vrot.slane %v1448_v46, 1 }
 0x149   : > { %1421 = vst.msk [vmem:[%s235_s29] sm:$0x1] %vm1420_vm3, %v1419_v47  ;;  %v1450_v49 = vadd.f32 %v1449_v48, %v1448_v46 }
 0x14b   : > { %1451 = vst.msk [vmem:[%s235_s29 + $0x1] sm:$0x1] %vm1420_vm3, %v1450_v49 }
 0x14c PF: > { %s16_s18 = sadd.s32 1, %s1912_s18  }
 0x14d   : > { %p13_p4 = scmp.ge.s32.totalorder %s16_s18, 4  }
 0x14f   :  { %15 = sbr.rel (!%p13_p4) target bundleno = 1 (0x1), region = 86 }

</bundles_post_ra>
